<compile_context>
chip_gen: v7x
topology: tpu7x:2x2x1
jax: 0.10.0
libtpu: 0.0.40
codegen_flags: <defaults>
</compile_context>

<pallas_src>
import functools
import itertools
import math

import numpy as np
import jax
import jax.numpy as jnp
from jax.experimental import pallas as pl
from jax.experimental.pallas import tpu as pltpu

LN_EPS = 1e-5
BN_EPS = 1e-5
_VMEM_LIMIT_BYTES = 48 * 1024 * 1024   # > v5e 16MiB / v6e 32MiB scoped defaults, < v7x 64MiB physical


# ----------------------------------------------------------------------------
# small math helpers (usable both inside kernels and in the jnp reference)
# ----------------------------------------------------------------------------
def _layernorm(x, gamma, beta):
    mu = jnp.mean(x, axis=-1, keepdims=True)
    var = jnp.mean((x - mu) ** 2, axis=-1, keepdims=True)   # biased, like torch
    return (x - mu) * jax.lax.rsqrt(var + LN_EPS) * gamma + beta


def _gelu_exact(x):
    # torch.nn.GELU default = exact (erf) formulation
    return 0.5 * x * (1.0 + jax.lax.erf(x * (1.0 / math.sqrt(2.0))))


# ----------------------------------------------------------------------------
# window partition glue (pure reshapes, identical to the PyTorch code)
# ----------------------------------------------------------------------------
def _window_partition(x, h, w, ws):
    b, l, c = x.shape
    if h == ws and w == ws:
        return x, (b, h, w, c, 1, 1, h, w, 0, 0, True)
    ximg = x.reshape(b, h, w, c)
    pad_b = (ws - h % ws) % ws
    pad_r = (ws - w % ws) % ws
    if pad_b or pad_r:
        ximg = jnp.pad(ximg, ((0, 0), (0, pad_b), (0, pad_r), (0, 0)))
    ph, pw = h + pad_b, w + pad_r
    nh, nw = ph // ws, pw // ws
    xw = ximg.reshape(b, nh, ws, nw, ws, c).transpose(0, 1, 3, 2, 4, 5)
    xw = xw.reshape(b * nh * nw, ws * ws, c)
    return xw, (b, h, w, c, nh, nw, ph, pw, pad_b, pad_r, False)


def _window_merge(xw, meta, ws):
    # only used by the pure-jnp reference; the kernel path fuses the merge.
    b, h, w, c, nh, nw, ph, pw, pad_b, pad_r, trivial = meta
    if trivial:
        return xw.reshape(b, h, w, c)
    a = xw.reshape(b, nh, nw, ws, ws, c).transpose(0, 1, 3, 2, 4, 5)
    a = a.reshape(b, ph, pw, c)
    if pad_b or pad_r:
        a = a[:, :h, :w, :]
    return a


def _pick_window_block(nwin, n_tok, c):
    """Pick how many windows share one attention grid step.

    Constraints: rows = d * n_tok must satisfy the (8,128) sublane rule
    (rows % 8 == 0) unless the block covers the whole array; rows bounded so
    VMEM stays comfortable; prefer keeping >= 2 grid blocks for megacore.
    """
    target_rows = 1024 if c <= 128 else 512
    cands = []
    for d in range(1, nwin + 1):
        if nwin % d:
            continue
        rows = d * n_tok
        if rows > target_rows or rows % 8 != 0:
            continue
        cands.append(d)
    if not cands:
        # no sublane-aligned divisor fits: fall back to the full array
        # (block == full extent is exempt from the (8,128) rule).
        return nwin
    multi = [d for d in cands if nwin // d >= 2]
    return max(multi) if multi else max(cands)


# ----------------------------------------------------------------------------
# Pallas kernels
# ----------------------------------------------------------------------------
def _attn_kernel(x_ref, lng_ref, lnb_ref, wqkv_ref, bqkv_ref, wproj_ref,
                 bproj_ref, bias_ref, o_ref,
                 *, num_heads, head_dim, w_blk, n_tok, matmul_dtype):
    """A block of w_blk windows per grid step.

    LN -> fused QKV matmul (N = 3C, head-major columns, softmax scale folded
    into the q columns) -> per-head window-batched score/softmax/PV -> single
    output projection -> residual add (x already loaded for the LN).
    """
    c = num_heads * head_dim
    x = x_ref[...]                                           # (rows, C) f32
    xn = _layernorm(x, lng_ref[0], lnb_ref[0]).astype(matmul_dtype)

    qkv = jnp.dot(xn, wqkv_ref[...],
                  preferred_element_type=jnp.float32) + bqkv_ref[0]
    q = qkv[:, :c].reshape(w_blk, n_tok, c)                  # head-major cols
    k = qkv[:, c:2 * c].reshape(w_blk, n_tok, c)
    v = qkv[:, 2 * c:].reshape(w_blk, n_tok, c)

    # TODO(synk): collapse the head loop into one 2-batch-dim einsum once
    # Mosaic dot_general supports (window, head) batching without relayouts.
    head_outs = []
    for hd_i in range(num_heads):
        sl = slice(hd_i * head_dim, (hd_i + 1) * head_dim)
        qh = q[:, :, sl].astype(matmul_dtype)
        kh = k[:, :, sl].astype(matmul_dtype)
        vh = v[:, :, sl].astype(matmul_dtype)
        s = jnp.einsum("bqd,bkd->bqk", qh, kh,
                       preferred_element_type=jnp.float32) + bias_ref[hd_i]
        s = s - jnp.max(s, axis=-1, keepdims=True)
        p = jnp.exp(s)
        p = p * pl.reciprocal(jnp.sum(p, axis=-1, keepdims=True), approx=False)
        head_outs.append(
            jnp.einsum("bqk,bkd->bqd", p.astype(matmul_dtype), vh,
                       preferred_element_type=jnp.float32))
    o = jnp.concatenate(head_outs, axis=-1).reshape(w_blk * n_tok, c)
    y = jnp.dot(o.astype(matmul_dtype), wproj_ref[...],
                preferred_element_type=jnp.float32) + bproj_ref[0]
    o_ref[...] = x + y                                       # residual folded in


def _conv_mlp_kernel(xw_ref, dw_w_ref, dw_b_ref, lng_ref, lnb_ref,
                     w1_ref, b1_ref, w2_ref, b2_ref, o_ref, pad_ref,
                     *, ks, hh, ww, wsz, nh, nw, pad, matmul_dtype):
    """Fused: window-merge -> depthwise ks x ks conv (BN folded, halo in a VMEM
    slab, halo-ring-only zeroing) -> x2 + MLP(x2), MLP = LN->fc1->GELU->fc2."""
    cdim = xw_ref.shape[-1]
    ph2, pw2 = pad_ref.shape[0], pad_ref.shape[1]

    # (a) fused window-merge: place each window's attention output straight
    #     into the padded slab (no HBM transpose between the two kernels).
    for wi in range(nh):
        for wj in range(nw):
            tile = xw_ref[wi * nw + wj].reshape(wsz, wsz, cdim)
            pad_ref[pad + wi * wsz: pad + (wi + 1) * wsz,
                    pad + wj * wsz: pad + (wj + 1) * wsz, :] = tile

    # (b) halo-only zeroing: just the 1-px ring the conv reads (also wipes any
    #     window-padding garbage when H, W are not multiples of window_size).
    if pad:
        zrow = jnp.zeros((pad, pw2, cdim), jnp.float32)
        zcol = jnp.zeros((ph2, pad, cdim), jnp.float32)
        pad_ref[0:pad, :, :] = zrow
        pad_ref[pad + hh: 2 * pad + hh, :, :] = zrow
        pad_ref[:, 0:pad, :] = zcol
        pad_ref[:, pad + ww: 2 * pad + ww, :] = zcol

    # (c) depthwise ks x ks conv, taps as static slab slices
    # TODO(synk): do the kj column shifts with pltpu.roll (XLU slot) so the
    # taps overlap the MLP matmuls instead of using offset vector loads.
    acc = jnp.zeros((hh, ww, cdim), jnp.float32)
    for ki in range(ks):
        for kj in range(ks):
            acc = acc + pad_ref[ki:ki + hh, kj:kj + ww, :] * dw_w_ref[ki * ks + kj]
    x2 = (acc + dw_b_ref[0]).reshape(hh * ww, cdim)          # conv output (L, C)

    # (d) MLP: LN -> fc1 -> GELU(exact) -> fc2 -> residual
    xn = _layernorm(x2, lng_ref[0], lnb_ref[0]).astype(matmul_dtype)
    hmid = jnp.dot(xn, w1_ref[...], preferred_element_type=jnp.float32) + b1_ref[0]
    hmid = _gelu_exact(hmid).astype(matmul_dtype)
    y = jnp.dot(hmid, w2_ref[...], preferred_element_type=jnp.float32) + b2_ref[0]
    o_ref[0] = x2 + y


# ----------------------------------------------------------------------------
# wrapper
# ----------------------------------------------------------------------------
def tiny_vit_block_forward(x, params, *, input_resolution, num_heads,
                           window_size, local_conv_size=3,
                           matmul_dtype=jnp.bfloat16):
    b, l, c = x.shape
    h, w = input_resolution
    assert l == h * w, "input feature has wrong size"
    head_dim = c // num_heads
    scale = head_dim ** -0.5
    hidden = params["w1"].shape[1]
    ws = window_size

    # ---- host-side weight prep: ONE fused head-major QKV weight (softmax
    # ---- scale folded into the q columns); MXU operands cast to matmul_dtype.
    wqkv3 = params["wqkv"].reshape(c, num_heads, 3 * head_dim)
    bqkv3 = params["bqkv"].reshape(num_heads, 3 * head_dim)
    wq = wqkv3[:, :, :head_dim].reshape(c, c) * scale
    wk = wqkv3[:, :, head_dim:2 * head_dim].reshape(c, c)
    wv = wqkv3[:, :, 2 * head_dim:].reshape(c, c)
    wqkv_hm = jnp.concatenate([wq, wk, wv], axis=1).astype(matmul_dtype)
    bq = bqkv3[:, :head_dim].reshape(c) * scale
    bk = bqkv3[:, head_dim:2 * head_dim].reshape(c)
    bv = bqkv3[:, 2 * head_dim:].reshape(c)
    bqkv_hm = jnp.concatenate([bq, bk, bv]).reshape(1, 3 * c).astype(jnp.float32)
    wproj = params["wproj"].astype(matmul_dtype)
    w1 = params["w1"].astype(matmul_dtype)
    w2 = params["w2"].astype(matmul_dtype)

    # -------- window partition (pure reshape glue) --------
    xw, meta = _window_partition(x, h, w, ws)
    nwin, n_tok, _ = xw.shape
    (_, _, _, _, nh, nw, ph, pw, _, _, _) = meta
    w_blk = _pick_window_block(nwin, n_tok, c)
    grid_w = nwin // w_blk
    rows = w_blk * n_tok
    xw_flat = xw.reshape(nwin * n_tok, c)

    # -------- windowed attention kernel (residual folded into output) --------
    # TODO(synk): mark the constant weight/bias BlockSpecs pipeline_mode=
    # pl.Buffered(1) to avoid double-buffering large weights on v7x's 64 MiB.
    attn_flat = pl.pallas_call(
        functools.partial(_attn_kernel, num_heads=num_heads, head_dim=head_dim,
                          w_blk=w_blk, n_tok=n_tok, matmul_dtype=matmul_dtype),
        out_shape=jax.ShapeDtypeStruct((nwin * n_tok, c), jnp.float32),
        grid_spec=pltpu.PrefetchScalarGridSpec(
            num_scalar_prefetch=0,
            grid=(grid_w,),
            in_specs=[
                pl.BlockSpec((rows, c), lambda i: (i, 0)),              # x block
                pl.BlockSpec((1, c), lambda i: (0, 0)),                 # ln gamma
                pl.BlockSpec((1, c), lambda i: (0, 0)),                 # ln beta
                pl.BlockSpec((c, 3 * c), lambda i: (0, 0)),             # fused Wqkv
                pl.BlockSpec((1, 3 * c), lambda i: (0, 0)),             # fused bqkv
                pl.BlockSpec((c, c), lambda i: (0, 0)),                 # wproj
                pl.BlockSpec((1, c), lambda i: (0, 0)),                 # bproj
                pl.BlockSpec((num_heads, n_tok, n_tok), lambda i: (0, 0, 0)),
            ],
            out_specs=pl.BlockSpec((rows, c), lambda i: (i, 0)),
        ),
        compiler_params=pltpu.CompilerParams(
            dimension_semantics=("parallel",),
            vmem_limit_bytes=_VMEM_LIMIT_BYTES),
    )(xw_flat, params["attn_ln_g"], params["attn_ln_b"], wqkv_hm, bqkv_hm,
      wproj, params["bproj"], params["attn_bias"])

    # free reshape: group windows per image; the merge itself happens inside
    # the conv+MLP kernel (no HBM-level transpose between the kernels).
    nwin_per_img = nh * nw
    xw_img = attn_flat.reshape(b * nwin_per_img, n_tok, c)

    # -------- fused window-merge + depthwise Conv2dBN + MLP + residual --------
    # TODO(synk): for very large resolutions / b==1 on v7x, tile H into row
    # strips with a 1-row halo (grid=(b, n_strips)) to feed the second core.
    pad = local_conv_size // 2
    out = pl.pallas_call(
        functools.partial(_conv_mlp_kernel, ks=local_conv_size, hh=h, ww=w,
                          wsz=ws, nh=nh, nw=nw, pad=pad,
                          matmul_dtype=matmul_dtype),
        out_shape=jax.ShapeDtypeStruct((b, l, c), jnp.float32),
        grid_spec=pltpu.PrefetchScalarGridSpec(
            num_scalar_prefetch=0,
            grid=(b,),
            in_specs=[
                pl.BlockSpec((nwin_per_img, n_tok, c), lambda i: (i, 0, 0)),
                pl.BlockSpec((local_conv_size ** 2, c), lambda i: (0, 0)),
                pl.BlockSpec((1, c), lambda i: (0, 0)),                 # dw bias
                pl.BlockSpec((1, c), lambda i: (0, 0)),                 # mlp ln g
                pl.BlockSpec((1, c), lambda i: (0, 0)),                 # mlp ln b
                pl.BlockSpec((c, hidden), lambda i: (0, 0)),            # w1
                pl.BlockSpec((1, hidden), lambda i: (0, 0)),            # b1
                pl.BlockSpec((hidden, c), lambda i: (0, 0)),            # w2
                pl.BlockSpec((1, c), lambda i: (0, 0)),                 # b2
            ],
            out_specs=pl.BlockSpec((1, l, c), lambda i: (i, 0, 0)),
            scratch_shapes=[pltpu.VMEM((ph + 2 * pad, pw + 2 * pad, c),
                                       jnp.float32)],
        ),
        compiler_params=pltpu.CompilerParams(
            dimension_semantics=("parallel",),
            vmem_limit_bytes=_VMEM_LIMIT_BYTES),
    )(xw_img, params["dw_w"], params["dw_b"], params["mlp_ln_g"],
      params["mlp_ln_b"], w1, params["b1"], w2, params["b2"])

    return out


# ----------------------------------------------------------------------------
# deterministic parameter init (shapes follow TinyViTBlock.__init__)
# ----------------------------------------------------------------------------
def init_params(key, dim, num_heads, window_size, mlp_ratio, local_conv_size=3):
    hidden = int(dim * mlp_ratio)
    ks = jax.random.split(key, 18)

    def rnd(k, shape, s=0.02):
        return s * jax.random.normal(k, shape, dtype=jnp.float32)

    p = {}
    # Attention (attn_ratio=1 -> qkv dim = 3*dim, proj: dim -> dim)
    p["attn_ln_g"] = 1.0 + rnd(ks[0], (1, dim))
    p["attn_ln_b"] = rnd(ks[1], (1, dim))
    p["wqkv"] = rnd(ks[2], (dim, 3 * dim), s=0.05)   # columns head-interleaved (q,k,v)
    p["bqkv"] = rnd(ks[3], (1, 3 * dim))
    p["wproj"] = rnd(ks[4], (dim, dim), s=0.05)      # rows head-major
    p["bproj"] = rnd(ks[5], (1, dim))

    # relative-position attention bias table + gather (matches PyTorch buffer logic)
    points = list(itertools.product(range(window_size), range(window_size)))
    n_pts = len(points)
    offsets, idxs = {}, []
    for p1 in points:
        for p2 in points:
            off = (abs(p1[0] - p2[0]), abs(p1[1] - p2[1]))
            if off not in offsets:
                offsets[off] = len(offsets)
            idxs.append(offsets[off])
    idxs = np.asarray(idxs, dtype=np.int32).reshape(n_pts, n_pts)
    biases = rnd(ks[6], (num_heads, len(offsets)), s=0.1)
    p["attn_bias"] = biases[:, idxs]                 # (num_heads, N, N)

    # depthwise Conv2dBN, BatchNorm folded (eval mode, running stats)
    conv_w = rnd(ks[7], (dim, local_conv_size, local_conv_size), s=0.1)  # (C, kh, kw)
    bn_g = 1.0 + rnd(ks[8], (dim,))
    bn_b = rnd(ks[9], (dim,))
    bn_mean = rnd(ks[10], (dim,), s=0.1)
    bn_var = 1.0 + jnp.abs(rnd(ks[11], (dim,), s=0.1))
    bn_scale = bn_g / jnp.sqrt(bn_var + BN_EPS)
    w_eff = conv_w * bn_scale[:, None, None]
    p["dw_w"] = jnp.transpose(w_eff, (1, 2, 0)).reshape(local_conv_size ** 2, dim)
    p["dw_b"] = (bn_b - bn_mean * bn_scale).reshape(1, dim)

    # Mlp (LN -> fc1 -> GELU -> fc2)
    p["mlp_ln_g"] = 1.0 + rnd(ks[12], (1, dim))
    p["mlp_ln_b"] = rnd(ks[13], (1, dim))
    p["w1"] = rnd(ks[14], (dim, hidden), s=0.05)
    p["b1"] = rnd(ks[15], (1, hidden))
    p["w2"] = rnd(ks[16], (hidden, dim), s=0.05)
    p["b2"] = rnd(ks[17], (1, dim))
    return p


# ----------------------------------------------------------------------------
# pure-jnp reference (mirrors the PyTorch forward) for a correctness check
# ----------------------------------------------------------------------------
def reference_forward(x, params, *, input_resolution, num_heads, window_size,
                      local_conv_size=3):
    b, l, c = x.shape
    h, w = input_resolution
    hd = c // num_heads
    scale = hd ** -0.5
    res = x

    xw, meta = _window_partition(x, h, w, window_size)
    nwin, n_tok, _ = xw.shape
    xn = _layernorm(xw, params["attn_ln_g"][0], params["attn_ln_b"][0])
    qkv = xn @ params["wqkv"] + params["bqkv"][0]
    qkv = qkv.reshape(nwin, n_tok, num_heads, 3 * hd)
    q, k, v = qkv[..., :hd], qkv[..., hd:2 * hd], qkv[..., 2 * hd:]
    att = jnp.einsum("bnhd,bmhd->bhnm", q, k) * scale + params["attn_bias"][None]
    att = jax.nn.softmax(att, axis=-1)
    o = jnp.einsum("bhnm,bmhd->bnhd", att, v).reshape(nwin, n_tok, c)
    o = o @ params["wproj"] + params["bproj"][0]
    attn_img = _window_merge(o, meta, window_size)

    x1 = res.reshape(b, h, w, c) + attn_img
    pad = local_conv_size // 2
    xp = jnp.pad(x1, ((0, 0), (pad, pad), (pad, pad), (0, 0)))
    acc = jnp.zeros_like(x1)
    for ki in range(local_conv_size):
        for kj in range(local_conv_size):
            acc = acc + xp[:, ki:ki + h, kj:kj + w, :] * params["dw_w"][ki * local_conv_size + kj]
    x2 = (acc + params["dw_b"][0]).reshape(b, l, c)

    xn = _layernorm(x2, params["mlp_ln_g"][0], params["mlp_ln_b"][0])
    hidv = _gelu_exact(xn @ params["w1"] + params["b1"][0])
    y = hidv @ params["w2"] + params["b2"][0]
    return x2 + y


# ----------------------------------------------------------------------------
if __name__ == "__main__":
    DIM = 32           # dim
    NUM_HEADS = 2      # head_dim = 16
    WINDOW = 4         # window_size
    RES = (8, 8)       # input_resolution -> 4 windows per image
    MLP_RATIO = 4.0    # hidden = 128
    B = 2
    L = RES[0] * RES[1]

    key = jax.random.PRNGKey(0)
    kx, kp = jax.random.split(key)
    x = jax.random.normal(kx, (B, L, DIM), dtype=jnp.float32)
    params = init_params(kp, DIM, NUM_HEADS, WINDOW, MLP_RATIO)

    ref = reference_forward(x, params, input_resolution=RES,
                            num_heads=NUM_HEADS, window_size=WINDOW)

    # fp32 MXU path: strict parity with the fp32 reference
    fwd_f32 = jax.jit(functools.partial(
        tiny_vit_block_forward, input_resolution=RES, num_heads=NUM_HEADS,
        window_size=WINDOW, matmul_dtype=jnp.float32))
    out_f32 = jax.block_until_ready(fwd_f32(x, params))
    assert out_f32.shape == (B, L, DIM)
    err32 = float(jnp.max(jnp.abs(out_f32 - ref)))
    assert np.allclose(np.asarray(out_f32), np.asarray(ref),
                       atol=2e-3, rtol=2e-3), err32

    # bf16 MXU path (default): ~2-4x MXU throughput on v6e/v7x, fp32 accumulation
    fwd_bf16 = jax.jit(functools.partial(
        tiny_vit_block_forward, input_resolution=RES, num_heads=NUM_HEADS,
        window_size=WINDOW))
    out_bf16 = jax.block_until_ready(fwd_bf16(x, params))
    assert out_bf16.shape == (B, L, DIM)
    err16 = float(jnp.max(jnp.abs(out_bf16 - ref)))
    assert np.allclose(np.asarray(out_bf16), np.asarray(ref),
                       atol=5e-2, rtol=5e-2), err16

    print("KERNEL_OK")
</pallas_src>

<mosaic_0001>
module attributes {stable_mosaic.version = 11 : i64} {
  func.func @_attn_kernel(%arg0: i32, %arg1: memref<64x32xf32, #tpu.memory_space<vmem>>, %arg2: memref<1x32xf32, #tpu.memory_space<vmem>>, %arg3: memref<1x32xf32, #tpu.memory_space<vmem>>, %arg4: memref<32x96xf32, #tpu.memory_space<vmem>>, %arg5: memref<1x96xf32, #tpu.memory_space<vmem>>, %arg6: memref<32x32xf32, #tpu.memory_space<vmem>>, %arg7: memref<1x32xf32, #tpu.memory_space<vmem>>, %arg8: memref<2x16x16xf32, #tpu.memory_space<vmem>>, %arg9: memref<64x32xf32, #tpu.memory_space<vmem>>) attributes {dimension_semantics = [#tpu.dimension_semantics<parallel>], iteration_bounds = array<i64: 2>, scalar_prefetch = 0 : i64, scratch_operands = 0 : i64, tpu.core_type = #tpu.core_type<tc>, window_params = [{transform_indices = @transform_0, window_bounds = array<i64: 64, 32>}, {pipeline_mode = #tpu.pipeline_mode<synchronous>, transform_indices = @transform_1, window_bounds = array<i64: 1, 32>}, {pipeline_mode = #tpu.pipeline_mode<synchronous>, transform_indices = @transform_2, window_bounds = array<i64: 1, 32>}, {pipeline_mode = #tpu.pipeline_mode<synchronous>, transform_indices = @transform_3, window_bounds = array<i64: 32, 96>}, {pipeline_mode = #tpu.pipeline_mode<synchronous>, transform_indices = @transform_4, window_bounds = array<i64: 1, 96>}, {pipeline_mode = #tpu.pipeline_mode<synchronous>, transform_indices = @transform_5, window_bounds = array<i64: 32, 32>}, {pipeline_mode = #tpu.pipeline_mode<synchronous>, transform_indices = @transform_6, window_bounds = array<i64: 1, 32>}, {pipeline_mode = #tpu.pipeline_mode<synchronous>, transform_indices = @transform_7, window_bounds = array<i64: 2, 16, 16>}, {transform_indices = @transform_8, window_bounds = array<i64: 64, 32>}]} {
    %c0 = arith.constant 0 : index
    %c0_0 = arith.constant 0 : index
    %0 = vector.load %arg1[%c0, %c0_0] : memref<64x32xf32, #tpu.memory_space<vmem>>, vector<64x32xf32>
    %c0_1 = arith.constant 0 : index
    %c0_2 = arith.constant 0 : index
    %1 = vector.load %arg2[%c0_1, %c0_2] : memref<1x32xf32, #tpu.memory_space<vmem>>, vector<1x32xf32>
    %2 = vector.shape_cast %1 : vector<1x32xf32> to vector<32xf32>
    %c0_3 = arith.constant 0 : index
    %c0_4 = arith.constant 0 : index
    %3 = vector.load %arg3[%c0_3, %c0_4] : memref<1x32xf32, #tpu.memory_space<vmem>>, vector<1x32xf32>
    %4 = vector.shape_cast %3 : vector<1x32xf32> to vector<32xf32>
    %cst = arith.constant dense<0.000000e+00> : vector<64xf32>
    %5 = vector.multi_reduction <add>, %0, %cst [1] : vector<64x32xf32> to vector<64xf32>
    %6 = vector.shape_cast %5 : vector<64xf32> to vector<64x1xf32>
    %cst_5 = arith.constant 3.200000e+01 : f32
    %7 = vector.broadcast %cst_5 : f32 to vector<64x1xf32>
    %8 = arith.divf %6, %7 : vector<64x1xf32>
    %9 = vector.broadcast %8 : vector<64x1xf32> to vector<64x32xf32>
    %10 = arith.subf %0, %9 : vector<64x32xf32>
    %11 = arith.mulf %10, %10 : vector<64x32xf32>
    %cst_6 = arith.constant dense<0.000000e+00> : vector<64xf32>
    %12 = vector.multi_reduction <add>, %11, %cst_6 [1] : vector<64x32xf32> to vector<64xf32>
    %13 = vector.shape_cast %12 : vector<64xf32> to vector<64x1xf32>
    %cst_7 = arith.constant 3.200000e+01 : f32
    %14 = vector.broadcast %cst_7 : f32 to vector<64x1xf32>
    %15 = arith.divf %13, %14 : vector<64x1xf32>
    %16 = vector.broadcast %8 : vector<64x1xf32> to vector<64x32xf32>
    %17 = arith.subf %0, %16 : vector<64x32xf32>
    %cst_8 = arith.constant 9.99999974E-6 : f32
    %18 = vector.broadcast %cst_8 : f32 to vector<64x1xf32>
    %19 = arith.addf %15, %18 : vector<64x1xf32>
    %20 = math.rsqrt %19 : vector<64x1xf32>
    %21 = vector.broadcast %20 : vector<64x1xf32> to vector<64x32xf32>
    %22 = arith.mulf %17, %21 : vector<64x32xf32>
    %23 = vector.shape_cast %2 : vector<32xf32> to vector<1x32xf32>
    %24 = vector.broadcast %23 : vector<1x32xf32> to vector<64x32xf32>
    %25 = arith.mulf %22, %24 : vector<64x32xf32>
    %26 = vector.shape_cast %4 : vector<32xf32> to vector<1x32xf32>
    %27 = vector.broadcast %26 : vector<1x32xf32> to vector<64x32xf32>
    %28 = arith.addf %25, %27 : vector<64x32xf32>
    %c0_9 = arith.constant 0 : index
    %c0_10 = arith.constant 0 : index
    %29 = vector.load %arg4[%c0_9, %c0_10] : memref<32x96xf32, #tpu.memory_space<vmem>>, vector<32x96xf32>
    %cst_11 = arith.constant dense<0.000000e+00> : vector<64x96xf32>
    %30 = tpu.matmul %28, %29, %cst_11 {dimension_numbers = #tpu.dot_dimension_numbers<[1], [0], [0], [1], [0, 0, 1, 1], [], []>} : vector<64x32xf32>, vector<32x96xf32>, vector<64x96xf32> -> vector<64x96xf32>
    %c0_12 = arith.constant 0 : index
    %c0_13 = arith.constant 0 : index
    %31 = vector.load %arg5[%c0_12, %c0_13] : memref<1x96xf32, #tpu.memory_space<vmem>>, vector<1x96xf32>
    %32 = vector.shape_cast %31 : vector<1x96xf32> to vector<96xf32>
    %33 = vector.shape_cast %32 : vector<96xf32> to vector<1x96xf32>
    %34 = vector.broadcast %33 : vector<1x96xf32> to vector<64x96xf32>
    %35 = arith.addf %30, %34 : vector<64x96xf32>
    %36 = vector.extract_strided_slice %35 {offsets = [0, 0], sizes = [64, 32], strides = [1, 1]} : vector<64x96xf32> to vector<64x32xf32>
    %37 = vector.shape_cast %36 : vector<64x32xf32> to vector<4x16x32xf32>
    %38 = vector.extract_strided_slice %35 {offsets = [0, 32], sizes = [64, 32], strides = [1, 1]} : vector<64x96xf32> to vector<64x32xf32>
    %39 = vector.shape_cast %38 : vector<64x32xf32> to vector<4x16x32xf32>
    %40 = vector.extract_strided_slice %35 {offsets = [0, 64], sizes = [64, 32], strides = [1, 1]} : vector<64x96xf32> to vector<64x32xf32>
    %41 = vector.shape_cast %40 : vector<64x32xf32> to vector<4x16x32xf32>
    %42 = vector.extract_strided_slice %37 {offsets = [0, 0, 0], sizes = [4, 16, 16], strides = [1, 1, 1]} : vector<4x16x32xf32> to vector<4x16x16xf32>
    %43 = vector.extract_strided_slice %39 {offsets = [0, 0, 0], sizes = [4, 16, 16], strides = [1, 1, 1]} : vector<4x16x32xf32> to vector<4x16x16xf32>
    %44 = vector.extract_strided_slice %41 {offsets = [0, 0, 0], sizes = [4, 16, 16], strides = [1, 1, 1]} : vector<4x16x32xf32> to vector<4x16x16xf32>
    "tpu.trace_start"() <{level = 10 : i32, message = "bqd,bkd->bqk"}> : () -> ()
    %cst_14 = arith.constant dense<0.000000e+00> : vector<4x16x16xf32>
    %45 = tpu.matmul %42, %43, %cst_14 {dimension_numbers = #tpu.dot_dimension_numbers<[2], [2], [1], [1], [0, 0, 0, 1, 1, 1], [0], [0]>} : vector<4x16x16xf32>, vector<4x16x16xf32>, vector<4x16x16xf32> -> vector<4x16x16xf32>
    "tpu.trace_stop"() : () -> ()
    %c0_15 = arith.constant 0 : index
    %c0_16 = arith.constant 0 : index
    %c0_17 = arith.constant 0 : index
    %46 = vector.load %arg8[%c0_15, %c0_16, %c0_17] : memref<2x16x16xf32, #tpu.memory_space<vmem>>, vector<1x16x16xf32>
    %47 = vector.shape_cast %46 : vector<1x16x16xf32> to vector<16x16xf32>
    %48 = vector.shape_cast %47 : vector<16x16xf32> to vector<1x16x16xf32>
    %49 = vector.broadcast %48 : vector<1x16x16xf32> to vector<4x16x16xf32>
    %50 = arith.addf %45, %49 : vector<4x16x16xf32>
    %cst_18 = arith.constant dense<0xFF800000> : vector<4x16xf32>
    %51 = vector.multi_reduction <maximumf>, %50, %cst_18 [2] : vector<4x16x16xf32> to vector<4x16xf32>
    %52 = vector.shape_cast %51 : vector<4x16xf32> to vector<4x16x1xf32>
    %53 = vector.broadcast %52 : vector<4x16x1xf32> to vector<4x16x16xf32>
    %54 = arith.subf %50, %53 : vector<4x16x16xf32>
    %55 = math.exp %54 : vector<4x16x16xf32>
    %cst_19 = arith.constant dense<0.000000e+00> : vector<4x16xf32>
    %56 = vector.multi_reduction <add>, %55, %cst_19 [2] : vector<4x16x16xf32> to vector<4x16xf32>
    %57 = vector.shape_cast %56 : vector<4x16xf32> to vector<4x16x1xf32>
    %58 = tpu.reciprocal %57 : vector<4x16x1xf32> -> vector<4x16x1xf32>
    %59 = vector.broadcast %58 : vector<4x16x1xf32> to vector<4x16x16xf32>
    %60 = arith.mulf %55, %59 : vector<4x16x16xf32>
    "tpu.trace_start"() <{level = 10 : i32, message = "bqk,bkd->bqd"}> : () -> ()
    %cst_20 = arith.constant dense<0.000000e+00> : vector<4x16x16xf32>
    %61 = tpu.matmul %60, %44, %cst_20 {dimension_numbers = #tpu.dot_dimension_numbers<[2], [1], [1], [2], [0, 0, 0, 1, 1, 2], [0], [0]>} : vector<4x16x16xf32>, vector<4x16x16xf32>, vector<4x16x16xf32> -> vector<4x16x16xf32>
    "tpu.trace_stop"() : () -> ()
    %62 = vector.extract_strided_slice %37 {offsets = [0, 0, 16], sizes = [4, 16, 16], strides = [1, 1, 1]} : vector<4x16x32xf32> to vector<4x16x16xf32>
    %63 = vector.extract_strided_slice %39 {offsets = [0, 0, 16], sizes = [4, 16, 16], strides = [1, 1, 1]} : vector<4x16x32xf32> to vector<4x16x16xf32>
    %64 = vector.extract_strided_slice %41 {offsets = [0, 0, 16], sizes = [4, 16, 16], strides = [1, 1, 1]} : vector<4x16x32xf32> to vector<4x16x16xf32>
    "tpu.trace_start"() <{level = 10 : i32, message = "bqd,bkd->bqk"}> : () -> ()
    %cst_21 = arith.constant dense<0.000000e+00> : vector<4x16x16xf32>
    %65 = tpu.matmul %62, %63, %cst_21 {dimension_numbers = #tpu.dot_dimension_numbers<[2], [2], [1], [1], [0, 0, 0, 1, 1, 1], [0], [0]>} : vector<4x16x16xf32>, vector<4x16x16xf32>, vector<4x16x16xf32> -> vector<4x16x16xf32>
    "tpu.trace_stop"() : () -> ()
    %c1 = arith.constant 1 : index
    %c0_22 = arith.constant 0 : index
    %c0_23 = arith.constant 0 : index
    %66 = vector.load %arg8[%c1, %c0_22, %c0_23] : memref<2x16x16xf32, #tpu.memory_space<vmem>>, vector<1x16x16xf32>
    %67 = vector.shape_cast %66 : vector<1x16x16xf32> to vector<16x16xf32>
    %68 = vector.shape_cast %67 : vector<16x16xf32> to vector<1x16x16xf32>
    %69 = vector.broadcast %68 : vector<1x16x16xf32> to vector<4x16x16xf32>
    %70 = arith.addf %65, %69 : vector<4x16x16xf32>
    %cst_24 = arith.constant dense<0xFF800000> : vector<4x16xf32>
    %71 = vector.multi_reduction <maximumf>, %70, %cst_24 [2] : vector<4x16x16xf32> to vector<4x16xf32>
    %72 = vector.shape_cast %71 : vector<4x16xf32> to vector<4x16x1xf32>
    %73 = vector.broadcast %72 : vector<4x16x1xf32> to vector<4x16x16xf32>
    %74 = arith.subf %70, %73 : vector<4x16x16xf32>
    %75 = math.exp %74 : vector<4x16x16xf32>
    %cst_25 = arith.constant dense<0.000000e+00> : vector<4x16xf32>
    %76 = vector.multi_reduction <add>, %75, %cst_25 [2] : vector<4x16x16xf32> to vector<4x16xf32>
    %77 = vector.shape_cast %76 : vector<4x16xf32> to vector<4x16x1xf32>
    %78 = tpu.reciprocal %77 : vector<4x16x1xf32> -> vector<4x16x1xf32>
    %79 = vector.broadcast %78 : vector<4x16x1xf32> to vector<4x16x16xf32>
    %80 = arith.mulf %75, %79 : vector<4x16x16xf32>
    "tpu.trace_start"() <{level = 10 : i32, message = "bqk,bkd->bqd"}> : () -> ()
    %cst_26 = arith.constant dense<0.000000e+00> : vector<4x16x16xf32>
    %81 = tpu.matmul %80, %64, %cst_26 {dimension_numbers = #tpu.dot_dimension_numbers<[2], [1], [1], [2], [0, 0, 0, 1, 1, 2], [0], [0]>} : vector<4x16x16xf32>, vector<4x16x16xf32>, vector<4x16x16xf32> -> vector<4x16x16xf32>
    "tpu.trace_stop"() : () -> ()
    %82 = tpu.concatenate %61, %81 in 2 : vector<4x16x16xf32>, vector<4x16x16xf32> -> vector<4x16x32xf32>
    %83 = vector.shape_cast %82 : vector<4x16x32xf32> to vector<64x32xf32>
    %c0_27 = arith.constant 0 : index
    %c0_28 = arith.constant 0 : index
    %84 = vector.load %arg6[%c0_27, %c0_28] : memref<32x32xf32, #tpu.memory_space<vmem>>, vector<32x32xf32>
    %cst_29 = arith.constant dense<0.000000e+00> : vector<64x32xf32>
    %85 = tpu.matmul %83, %84, %cst_29 {dimension_numbers = #tpu.dot_dimension_numbers<[1], [0], [0], [1], [0, 0, 1, 1], [], []>} : vector<64x32xf32>, vector<32x32xf32>, vector<64x32xf32> -> vector<64x32xf32>
    %c0_30 = arith.constant 0 : index
    %c0_31 = arith.constant 0 : index
    %86 = vector.load %arg7[%c0_30, %c0_31] : memref<1x32xf32, #tpu.memory_space<vmem>>, vector<1x32xf32>
    %87 = vector.shape_cast %86 : vector<1x32xf32> to vector<32xf32>
    %88 = vector.shape_cast %87 : vector<32xf32> to vector<1x32xf32>
    %89 = vector.broadcast %88 : vector<1x32xf32> to vector<64x32xf32>
    %90 = arith.addf %85, %89 : vector<64x32xf32>
    %91 = arith.addf %0, %90 : vector<64x32xf32>
    %c0_32 = arith.constant 0 : index
    %c0_33 = arith.constant 0 : index
    %92 = vector.load %arg9[%c0_32, %c0_33] : memref<64x32xf32, #tpu.memory_space<vmem>>, vector<64x32xf32>
    tpu.vector_store %arg9[%c0_32, %c0_33], %91 {strides = array<i32>} : memref<64x32xf32, #tpu.memory_space<vmem>>, vector<64x32xf32>,
    return
  }
  func.func @transform_0(%arg0: i32) -> (i32, i32) {
    %c0_i32 = arith.constant 0 : i32
    %c0_i32_0 = arith.constant 0 : i32
    return %arg0, %c0_i32 : i32, i32
  }
  func.func @transform_1(%arg0: i32) -> (i32, i32) {
    %c0_i32 = arith.constant 0 : i32
    %c0_i32_0 = arith.constant 0 : i32
    %c0_i32_1 = arith.constant 0 : i32
    return %c0_i32, %c0_i32_0 : i32, i32
  }
  func.func @transform_2(%arg0: i32) -> (i32, i32) {
    %c0_i32 = arith.constant 0 : i32
    %c0_i32_0 = arith.constant 0 : i32
    %c0_i32_1 = arith.constant 0 : i32
    return %c0_i32, %c0_i32_0 : i32, i32
  }
  func.func @transform_3(%arg0: i32) -> (i32, i32) {
    %c0_i32 = arith.constant 0 : i32
    %c0_i32_0 = arith.constant 0 : i32
    %c0_i32_1 = arith.constant 0 : i32
    return %c0_i32, %c0_i32_0 : i32, i32
  }
  func.func @transform_4(%arg0: i32) -> (i32, i32) {
    %c0_i32 = arith.constant 0 : i32
    %c0_i32_0 = arith.constant 0 : i32
    %c0_i32_1 = arith.constant 0 : i32
    return %c0_i32, %c0_i32_0 : i32, i32
  }
  func.func @transform_5(%arg0: i32) -> (i32, i32) {
    %c0_i32 = arith.constant 0 : i32
    %c0_i32_0 = arith.constant 0 : i32
    %c0_i32_1 = arith.constant 0 : i32
    return %c0_i32, %c0_i32_0 : i32, i32
  }
  func.func @transform_6(%arg0: i32) -> (i32, i32) {
    %c0_i32 = arith.constant 0 : i32
    %c0_i32_0 = arith.constant 0 : i32
    %c0_i32_1 = arith.constant 0 : i32
    return %c0_i32, %c0_i32_0 : i32, i32
  }
  func.func @transform_7(%arg0: i32) -> (i32, i32, i32) {
    %c0_i32 = arith.constant 0 : i32
    %c0_i32_0 = arith.constant 0 : i32
    %c0_i32_1 = arith.constant 0 : i32
    %c0_i32_2 = arith.constant 0 : i32
    return %c0_i32, %c0_i32_0, %c0_i32_1 : i32, i32, i32
  }
  func.func @transform_8(%arg0: i32) -> (i32, i32) {
    %c0_i32 = arith.constant 0 : i32
    %c0_i32_0 = arith.constant 0 : i32
    return %arg0, %c0_i32 : i32, i32
  }
}

module attributes {stable_mosaic.version = 11 : i64} {
  func.func @_conv_mlp_kernel(%arg0: i32, %arg1: memref<4x16x32xf32, #tpu.memory_space<vmem>>, %arg2: memref<9x32xf32, #tpu.memory_space<vmem>>, %arg3: memref<1x32xf32, #tpu.memory_space<vmem>>, %arg4: memref<1x32xf32, #tpu.memory_space<vmem>>, %arg5: memref<1x32xf32, #tpu.memory_space<vmem>>, %arg6: memref<32x128xf32, #tpu.memory_space<vmem>>, %arg7: memref<1x128xf32, #tpu.memory_space<vmem>>, %arg8: memref<128x32xf32, #tpu.memory_space<vmem>>, %arg9: memref<1x32xf32, #tpu.memory_space<vmem>>, %arg10: memref<1x64x32xf32, #tpu.memory_space<vmem>>, %arg11: memref<10x10x32xf32, #tpu.memory_space<vmem>>) attributes {dimension_semantics = [#tpu.dimension_semantics<parallel>], iteration_bounds = array<i64: 2>, scalar_prefetch = 0 : i64, scratch_operands = 1 : i64, tpu.core_type = #tpu.core_type<tc>, window_params = [{transform_indices = @transform_0, window_bounds = array<i64: 4, 16, 32>}, {pipeline_mode = #tpu.pipeline_mode<synchronous>, transform_indices = @transform_1, window_bounds = array<i64: 9, 32>}, {pipeline_mode = #tpu.pipeline_mode<synchronous>, transform_indices = @transform_2, window_bounds = array<i64: 1, 32>}, {pipeline_mode = #tpu.pipeline_mode<synchronous>, transform_indices = @transform_3, window_bounds = array<i64: 1, 32>}, {pipeline_mode = #tpu.pipeline_mode<synchronous>, transform_indices = @transform_4, window_bounds = array<i64: 1, 32>}, {pipeline_mode = #tpu.pipeline_mode<synchronous>, transform_indices = @transform_5, window_bounds = array<i64: 32, 128>}, {pipeline_mode = #tpu.pipeline_mode<synchronous>, transform_indices = @transform_6, window_bounds = array<i64: 1, 128>}, {pipeline_mode = #tpu.pipeline_mode<synchronous>, transform_indices = @transform_7, window_bounds = array<i64: 128, 32>}, {pipeline_mode = #tpu.pipeline_mode<synchronous>, transform_indices = @transform_8, window_bounds = array<i64: 1, 32>}, {transform_indices = @transform_9, window_bounds = array<i64: 1, 64, 32>}]} {
    %c0 = arith.constant 0 : index
    %c0_0 = arith.constant 0 : index
    %c0_1 = arith.constant 0 : index
    %0 = vector.load %arg1[%c0, %c0_0, %c0_1] : memref<4x16x32xf32, #tpu.memory_space<vmem>>, vector<1x16x32xf32>
    %1 = vector.shape_cast %0 : vector<1x16x32xf32> to vector<16x32xf32>
    %2 = vector.shape_cast %1 : vector<16x32xf32> to vector<4x4x32xf32>
    %c1 = arith.constant 1 : index
    %c1_2 = arith.constant 1 : index
    %c0_3 = arith.constant 0 : index
    %3 = vector.load %arg11[%c1, %c1_2, %c0_3] : memref<10x10x32xf32, #tpu.memory_space<vmem>>, vector<4x4x32xf32>
    tpu.vector_store %arg11[%c1, %c1_2, %c0_3], %2 {strides = array<i32>} : memref<10x10x32xf32, #tpu.memory_space<vmem>>, vector<4x4x32xf32>,
    %c1_4 = arith.constant 1 : index
    %c0_5 = arith.constant 0 : index
    %c0_6 = arith.constant 0 : index
    %4 = vector.load %arg1[%c1_4, %c0_5, %c0_6] : memref<4x16x32xf32, #tpu.memory_space<vmem>>, vector<1x16x32xf32>
    %5 = vector.shape_cast %4 : vector<1x16x32xf32> to vector<16x32xf32>
    %6 = vector.shape_cast %5 : vector<16x32xf32> to vector<4x4x32xf32>
    %c1_7 = arith.constant 1 : index
    %c5 = arith.constant 5 : index
    %c0_8 = arith.constant 0 : index
    %7 = vector.load %arg11[%c1_7, %c5, %c0_8] : memref<10x10x32xf32, #tpu.memory_space<vmem>>, vector<4x4x32xf32>
    tpu.vector_store %arg11[%c1_7, %c5, %c0_8], %6 {strides = array<i32>} : memref<10x10x32xf32, #tpu.memory_space<vmem>>, vector<4x4x32xf32>,
    %c2 = arith.constant 2 : index
    %c0_9 = arith.constant 0 : index
    %c0_10 = arith.constant 0 : index
    %8 = vector.load %arg1[%c2, %c0_9, %c0_10] : memref<4x16x32xf32, #tpu.memory_space<vmem>>, vector<1x16x32xf32>
    %9 = vector.shape_cast %8 : vector<1x16x32xf32> to vector<16x32xf32>
    %10 = vector.shape_cast %9 : vector<16x32xf32> to vector<4x4x32xf32>
    %c5_11 = arith.constant 5 : index
    %c1_12 = arith.constant 1 : index
    %c0_13 = arith.constant 0 : index
    %11 = vector.load %arg11[%c5_11, %c1_12, %c0_13] : memref<10x10x32xf32, #tpu.memory_space<vmem>>, vector<4x4x32xf32>
    tpu.vector_store %arg11[%c5_11, %c1_12, %c0_13], %10 {strides = array<i32>} : memref<10x10x32xf32, #tpu.memory_space<vmem>>, vector<4x4x32xf32>,
    %c3 = arith.constant 3 : index
    %c0_14 = arith.constant 0 : index
    %c0_15 = arith.constant 0 : index
    %12 = vector.load %arg1[%c3, %c0_14, %c0_15] : memref<4x16x32xf32, #tpu.memory_space<vmem>>, vector<1x16x32xf32>
    %13 = vector.shape_cast %12 : vector<1x16x32xf32> to vector<16x32xf32>
    %14 = vector.shape_cast %13 : vector<16x32xf32> to vector<4x4x32xf32>
    %c5_16 = arith.constant 5 : index
    %c5_17 = arith.constant 5 : index
    %c0_18 = arith.constant 0 : index
    %15 = vector.load %arg11[%c5_16, %c5_17, %c0_18] : memref<10x10x32xf32, #tpu.memory_space<vmem>>, vector<4x4x32xf32>
    tpu.vector_store %arg11[%c5_16, %c5_17, %c0_18], %14 {strides = array<i32>} : memref<10x10x32xf32, #tpu.memory_space<vmem>>, vector<4x4x32xf32>,
    %cst = arith.constant 0.000000e+00 : f32
    %16 = vector.broadcast %cst : f32 to vector<1x10x32xf32>
    %cst_19 = arith.constant 0.000000e+00 : f32
    %17 = vector.broadcast %cst_19 : f32 to vector<10x1x32xf32>
    %c0_20 = arith.constant 0 : index
    %c0_21 = arith.constant 0 : index
    %c0_22 = arith.constant 0 : index
    %18 = vector.load %arg11[%c0_20, %c0_21, %c0_22] : memref<10x10x32xf32, #tpu.memory_space<vmem>>, vector<1x10x32xf32>
    tpu.vector_store %arg11[%c0_20, %c0_21, %c0_22], %16 {strides = array<i32>} : memref<10x10x32xf32, #tpu.memory_space<vmem>>, vector<1x10x32xf32>,
    %c9 = arith.constant 9 : index
    %c0_23 = arith.constant 0 : index
    %c0_24 = arith.constant 0 : index
    %19 = vector.load %arg11[%c9, %c0_23, %c0_24] : memref<10x10x32xf32, #tpu.memory_space<vmem>>, vector<1x10x32xf32>
    tpu.vector_store %arg11[%c9, %c0_23, %c0_24], %16 {strides = array<i32>} : memref<10x10x32xf32, #tpu.memory_space<vmem>>, vector<1x10x32xf32>,
    %c0_25 = arith.constant 0 : index
    %c0_26 = arith.constant 0 : index
    %c0_27 = arith.constant 0 : index
    %20 = vector.load %arg11[%c0_25, %c0_26, %c0_27] : memref<10x10x32xf32, #tpu.memory_space<vmem>>, vector<10x1x32xf32>
    tpu.vector_store %arg11[%c0_25, %c0_26, %c0_27], %17 {strides = array<i32>} : memref<10x10x32xf32, #tpu.memory_space<vmem>>, vector<10x1x32xf32>,
    %c0_28 = arith.constant 0 : index
    %c9_29 = arith.constant 9 : index
    %c0_30 = arith.constant 0 : index
    %21 = vector.load %arg11[%c0_28, %c9_29, %c0_30] : memref<10x10x32xf32, #tpu.memory_space<vmem>>, vector<10x1x32xf32>
    tpu.vector_store %arg11[%c0_28, %c9_29, %c0_30], %17 {strides = array<i32>} : memref<10x10x32xf32, #tpu.memory_space<vmem>>, vector<10x1x32xf32>,
    %cst_31 = arith.constant 0.000000e+00 : f32
    %22 = vector.broadcast %cst_31 : f32 to vector<8x8x32xf32>
    %c0_32 = arith.constant 0 : index
    %c0_33 = arith.constant 0 : index
    %c0_34 = arith.constant 0 : index
    %23 = vector.load %arg11[%c0_32, %c0_33, %c0_34] : memref<10x10x32xf32, #tpu.memory_space<vmem>>, vector<8x8x32xf32>
    %c0_35 = arith.constant 0 : index
    %c0_36 = arith.constant 0 : index
    %24 = vector.load %arg2[%c0_35, %c0_36] : memref<9x32xf32, #tpu.memory_space<vmem>>, vector<1x32xf32>
    %25 = vector.shape_cast %24 : vector<1x32xf32> to vector<32xf32>
    %26 = vector.shape_cast %25 : vector<32xf32> to vector<1x1x32xf32>
    %27 = vector.broadcast %26 : vector<1x1x32xf32> to vector<8x8x32xf32>
    %28 = arith.mulf %23, %27 : vector<8x8x32xf32>
    %29 = arith.addf %22, %28 : vector<8x8x32xf32>
    %c0_37 = arith.constant 0 : index
    %c1_38 = arith.constant 1 : index
    %c0_39 = arith.constant 0 : index
    %30 = vector.load %arg11[%c0_37, %c1_38, %c0_39] : memref<10x10x32xf32, #tpu.memory_space<vmem>>, vector<8x8x32xf32>
    %c1_40 = arith.constant 1 : index
    %c0_41 = arith.constant 0 : index
    %31 = vector.load %arg2[%c1_40, %c0_41] : memref<9x32xf32, #tpu.memory_space<vmem>>, vector<1x32xf32>
    %32 = vector.shape_cast %31 : vector<1x32xf32> to vector<32xf32>
    %33 = vector.shape_cast %32 : vector<32xf32> to vector<1x1x32xf32>
    %34 = vector.broadcast %33 : vector<1x1x32xf32> to vector<8x8x32xf32>
    %35 = arith.mulf %30, %34 : vector<8x8x32xf32>
    %36 = arith.addf %29, %35 : vector<8x8x32xf32>
    %c0_42 = arith.constant 0 : index
    %c2_43 = arith.constant 2 : index
    %c0_44 = arith.constant 0 : index
    %37 = vector.load %arg11[%c0_42, %c2_43, %c0_44] : memref<10x10x32xf32, #tpu.memory_space<vmem>>, vector<8x8x32xf32>
    %c2_45 = arith.constant 2 : index
    %c0_46 = arith.constant 0 : index
    %38 = vector.load %arg2[%c2_45, %c0_46] : memref<9x32xf32, #tpu.memory_space<vmem>>, vector<1x32xf32>
    %39 = vector.shape_cast %38 : vector<1x32xf32> to vector<32xf32>
    %40 = vector.shape_cast %39 : vector<32xf32> to vector<1x1x32xf32>
    %41 = vector.broadcast %40 : vector<1x1x32xf32> to vector<8x8x32xf32>
    %42 = arith.mulf %37, %41 : vector<8x8x32xf32>
    %43 = arith.addf %36, %42 : vector<8x8x32xf32>
    %c1_47 = arith.constant 1 : index
    %c0_48 = arith.constant 0 : index
    %c0_49 = arith.constant 0 : index
    %44 = vector.load %arg11[%c1_47, %c0_48, %c0_49] : memref<10x10x32xf32, #tpu.memory_space<vmem>>, vector<8x8x32xf32>
    %c3_50 = arith.constant 3 : index
    %c0_51 = arith.constant 0 : index
    %45 = vector.load %arg2[%c3_50, %c0_51] : memref<9x32xf32, #tpu.memory_space<vmem>>, vector<1x32xf32>
    %46 = vector.shape_cast %45 : vector<1x32xf32> to vector<32xf32>
    %47 = vector.shape_cast %46 : vector<32xf32> to vector<1x1x32xf32>
    %48 = vector.broadcast %47 : vector<1x1x32xf32> to vector<8x8x32xf32>
    %49 = arith.mulf %44, %48 : vector<8x8x32xf32>
    %50 = arith.addf %43, %49 : vector<8x8x32xf32>
    %c1_52 = arith.constant 1 : index
    %c1_53 = arith.constant 1 : index
    %c0_54 = arith.constant 0 : index
    %51 = vector.load %arg11[%c1_52, %c1_53, %c0_54] : memref<10x10x32xf32, #tpu.memory_space<vmem>>, vector<8x8x32xf32>
    %c4 = arith.constant 4 : index
    %c0_55 = arith.constant 0 : index
    %52 = vector.load %arg2[%c4, %c0_55] : memref<9x32xf32, #tpu.memory_space<vmem>>, vector<1x32xf32>
    %53 = vector.shape_cast %52 : vector<1x32xf32> to vector<32xf32>
    %54 = vector.shape_cast %53 : vector<32xf32> to vector<1x1x32xf32>
    %55 = vector.broadcast %54 : vector<1x1x32xf32> to vector<8x8x32xf32>
    %56 = arith.mulf %51, %55 : vector<8x8x32xf32>
    %57 = arith.addf %50, %56 : vector<8x8x32xf32>
    %c1_56 = arith.constant 1 : index
    %c2_57 = arith.constant 2 : index
    %c0_58 = arith.constant 0 : index
    %58 = vector.load %arg11[%c1_56, %c2_57, %c0_58] : memref<10x10x32xf32, #tpu.memory_space<vmem>>, vector<8x8x32xf32>
    %c5_59 = arith.constant 5 : index
    %c0_60 = arith.constant 0 : index
    %59 = vector.load %arg2[%c5_59, %c0_60] : memref<9x32xf32, #tpu.memory_space<vmem>>, vector<1x32xf32>
    %60 = vector.shape_cast %59 : vector<1x32xf32> to vector<32xf32>
    %61 = vector.shape_cast %60 : vector<32xf32> to vector<1x1x32xf32>
    %62 = vector.broadcast %61 : vector<1x1x32xf32> to vector<8x8x32xf32>
    %63 = arith.mulf %58, %62 : vector<8x8x32xf32>
    %64 = arith.addf %57, %63 : vector<8x8x32xf32>
    %c2_61 = arith.constant 2 : index
    %c0_62 = arith.constant 0 : index
    %c0_63 = arith.constant 0 : index
    %65 = vector.load %arg11[%c2_61, %c0_62, %c0_63] : memref<10x10x32xf32, #tpu.memory_space<vmem>>, vector<8x8x32xf32>
    %c6 = arith.constant 6 : index
    %c0_64 = arith.constant 0 : index
    %66 = vector.load %arg2[%c6, %c0_64] : memref<9x32xf32, #tpu.memory_space<vmem>>, vector<1x32xf32>
    %67 = vector.shape_cast %66 : vector<1x32xf32> to vector<32xf32>
    %68 = vector.shape_cast %67 : vector<32xf32> to vector<1x1x32xf32>
    %69 = vector.broadcast %68 : vector<1x1x32xf32> to vector<8x8x32xf32>
    %70 = arith.mulf %65, %69 : vector<8x8x32xf32>
    %71 = arith.addf %64, %70 : vector<8x8x32xf32>
    %c2_65 = arith.constant 2 : index
    %c1_66 = arith.constant 1 : index
    %c0_67 = arith.constant 0 : index
    %72 = vector.load %arg11[%c2_65, %c1_66, %c0_67] : memref<10x10x32xf32, #tpu.memory_space<vmem>>, vector<8x8x32xf32>
    %c7 = arith.constant 7 : index
    %c0_68 = arith.constant 0 : index
    %73 = vector.load %arg2[%c7, %c0_68] : memref<9x32xf32, #tpu.memory_space<vmem>>, vector<1x32xf32>
    %74 = vector.shape_cast %73 : vector<1x32xf32> to vector<32xf32>
    %75 = vector.shape_cast %74 : vector<32xf32> to vector<1x1x32xf32>
    %76 = vector.broadcast %75 : vector<1x1x32xf32> to vector<8x8x32xf32>
    %77 = arith.mulf %72, %76 : vector<8x8x32xf32>
    %78 = arith.addf %71, %77 : vector<8x8x32xf32>
    %c2_69 = arith.constant 2 : index
    %c2_70 = arith.constant 2 : index
    %c0_71 = arith.constant 0 : index
    %79 = vector.load %arg11[%c2_69, %c2_70, %c0_71] : memref<10x10x32xf32, #tpu.memory_space<vmem>>, vector<8x8x32xf32>
    %c8 = arith.constant 8 : index
    %c0_72 = arith.constant 0 : index
    %80 = vector.load %arg2[%c8, %c0_72] : memref<9x32xf32, #tpu.memory_space<vmem>>, vector<1x32xf32>
    %81 = vector.shape_cast %80 : vector<1x32xf32> to vector<32xf32>
    %82 = vector.shape_cast %81 : vector<32xf32> to vector<1x1x32xf32>
    %83 = vector.broadcast %82 : vector<1x1x32xf32> to vector<8x8x32xf32>
    %84 = arith.mulf %79, %83 : vector<8x8x32xf32>
    %85 = arith.addf %78, %84 : vector<8x8x32xf32>
    %c0_73 = arith.constant 0 : index
    %c0_74 = arith.constant 0 : index
    %86 = vector.load %arg3[%c0_73, %c0_74] : memref<1x32xf32, #tpu.memory_space<vmem>>, vector<1x32xf32>
    %87 = vector.shape_cast %86 : vector<1x32xf32> to vector<32xf32>
    %88 = vector.shape_cast %87 : vector<32xf32> to vector<1x1x32xf32>
    %89 = vector.broadcast %88 : vector<1x1x32xf32> to vector<8x8x32xf32>
    %90 = arith.addf %85, %89 : vector<8x8x32xf32>
    %91 = vector.shape_cast %90 : vector<8x8x32xf32> to vector<64x32xf32>
    %c0_75 = arith.constant 0 : index
    %c0_76 = arith.constant 0 : index
    %92 = vector.load %arg4[%c0_75, %c0_76] : memref<1x32xf32, #tpu.memory_space<vmem>>, vector<1x32xf32>
    %93 = vector.shape_cast %92 : vector<1x32xf32> to vector<32xf32>
    %c0_77 = arith.constant 0 : index
    %c0_78 = arith.constant 0 : index
    %94 = vector.load %arg5[%c0_77, %c0_78] : memref<1x32xf32, #tpu.memory_space<vmem>>, vector<1x32xf32>
    %95 = vector.shape_cast %94 : vector<1x32xf32> to vector<32xf32>
    %cst_79 = arith.constant dense<0.000000e+00> : vector<64xf32>
    %96 = vector.multi_reduction <add>, %91, %cst_79 [1] : vector<64x32xf32> to vector<64xf32>
    %97 = vector.shape_cast %96 : vector<64xf32> to vector<64x1xf32>
    %cst_80 = arith.constant 3.200000e+01 : f32
    %98 = vector.broadcast %cst_80 : f32 to vector<64x1xf32>
    %99 = arith.divf %97, %98 : vector<64x1xf32>
    %100 = vector.broadcast %99 : vector<64x1xf32> to vector<64x32xf32>
    %101 = arith.subf %91, %100 : vector<64x32xf32>
    %102 = arith.mulf %101, %101 : vector<64x32xf32>
    %cst_81 = arith.constant dense<0.000000e+00> : vector<64xf32>
    %103 = vector.multi_reduction <add>, %102, %cst_81 [1] : vector<64x32xf32> to vector<64xf32>
    %104 = vector.shape_cast %103 : vector<64xf32> to vector<64x1xf32>
    %cst_82 = arith.constant 3.200000e+01 : f32
    %105 = vector.broadcast %cst_82 : f32 to vector<64x1xf32>
    %106 = arith.divf %104, %105 : vector<64x1xf32>
    %107 = vector.broadcast %99 : vector<64x1xf32> to vector<64x32xf32>
    %108 = arith.subf %91, %107 : vector<64x32xf32>
    %cst_83 = arith.constant 9.99999974E-6 : f32
    %109 = vector.broadcast %cst_83 : f32 to vector<64x1xf32>
    %110 = arith.addf %106, %109 : vector<64x1xf32>
    %111 = math.rsqrt %110 : vector<64x1xf32>
    %112 = vector.broadcast %111 : vector<64x1xf32> to vector<64x32xf32>
    %113 = arith.mulf %108, %112 : vector<64x32xf32>
    %114 = vector.shape_cast %93 : vector<32xf32> to vector<1x32xf32>
    %115 = vector.broadcast %114 : vector<1x32xf32> to vector<64x32xf32>
    %116 = arith.mulf %113, %115 : vector<64x32xf32>
    %117 = vector.shape_cast %95 : vector<32xf32> to vector<1x32xf32>
    %118 = vector.broadcast %117 : vector<1x32xf32> to vector<64x32xf32>
    %119 = arith.addf %116, %118 : vector<64x32xf32>
    %c0_84 = arith.constant 0 : index
    %c0_85 = arith.constant 0 : index
    %120 = vector.load %arg6[%c0_84, %c0_85] : memref<32x128xf32, #tpu.memory_space<vmem>>, vector<32x128xf32>
    %cst_86 = arith.constant dense<0.000000e+00> : vector<64x128xf32>
    %121 = tpu.matmul %119, %120, %cst_86 {dimension_numbers = #tpu.dot_dimension_numbers<[1], [0], [0], [1], [0, 0, 1, 1], [], []>} : vector<64x32xf32>, vector<32x128xf32>, vector<64x128xf32> -> vector<64x128xf32>
    %c0_87 = arith.constant 0 : index
    %c0_88 = arith.constant 0 : index
    %122 = vector.load %arg7[%c0_87, %c0_88] : memref<1x128xf32, #tpu.memory_space<vmem>>, vector<1x128xf32>
    %123 = vector.shape_cast %122 : vector<1x128xf32> to vector<128xf32>
    %124 = vector.shape_cast %123 : vector<128xf32> to vector<1x128xf32>
    %125 = vector.broadcast %124 : vector<1x128xf32> to vector<64x128xf32>
    %126 = arith.addf %121, %125 : vector<64x128xf32>
    %cst_89 = arith.constant 5.000000e-01 : f32
    %127 = vector.broadcast %cst_89 : f32 to vector<64x128xf32>
    %128 = arith.mulf %127, %126 : vector<64x128xf32>
    %cst_90 = arith.constant 0.707106769 : f32
    %129 = vector.broadcast %cst_90 : f32 to vector<64x128xf32>
    %130 = arith.mulf %126, %129 : vector<64x128xf32>
    %131 = math.erf %130 : vector<64x128xf32>
    %cst_91 = arith.constant 1.000000e+00 : f32
    %132 = vector.broadcast %cst_91 : f32 to vector<64x128xf32>
    %133 = arith.addf %132, %131 : vector<64x128xf32>
    %134 = arith.mulf %128, %133 : vector<64x128xf32>
    %c0_92 = arith.constant 0 : index
    %c0_93 = arith.constant 0 : index
    %135 = vector.load %arg8[%c0_92, %c0_93] : memref<128x32xf32, #tpu.memory_space<vmem>>, vector<128x32xf32>
    %cst_94 = arith.constant dense<0.000000e+00> : vector<64x32xf32>
    %136 = tpu.matmul %134, %135, %cst_94 {dimension_numbers = #tpu.dot_dimension_numbers<[1], [0], [0], [1], [0, 0, 1, 1], [], []>} : vector<64x128xf32>, vector<128x32xf32>, vector<64x32xf32> -> vector<64x32xf32>
    %c0_95 = arith.constant 0 : index
    %c0_96 = arith.constant 0 : index
    %137 = vector.load %arg9[%c0_95, %c0_96] : memref<1x32xf32, #tpu.memory_space<vmem>>, vector<1x32xf32>
    %138 = vector.shape_cast %137 : vector<1x32xf32> to vector<32xf32>
    %139 = vector.shape_cast %138 : vector<32xf32> to vector<1x32xf32>
    %140 = vector.broadcast %139 : vector<1x32xf32> to vector<64x32xf32>
    %141 = arith.addf %136, %140 : vector<64x32xf32>
    %142 = arith.addf %91, %141 : vector<64x32xf32>
    %c0_97 = arith.constant 0 : index
    %c0_98 = arith.constant 0 : index
    %c0_99 = arith.constant 0 : index
    %143 = vector.load %arg10[%c0_97, %c0_98, %c0_99] : memref<1x64x32xf32, #tpu.memory_space<vmem>>, vector<1x64x32xf32>
    %144 = vector.shape_cast %143 : vector<1x64x32xf32> to vector<64x32xf32>
    %145 = vector.shape_cast %142 : vector<64x32xf32> to vector<1x64x32xf32>
    tpu.vector_store %arg10[%c0_97, %c0_98, %c0_99], %145 {strides = array<i32>} : memref<1x64x32xf32, #tpu.memory_space<vmem>>, vector<1x64x32xf32>,
    return
  }
  func.func @transform_0(%arg0: i32) -> (i32, i32, i32) {
    %c0_i32 = arith.constant 0 : i32
    %c0_i32_0 = arith.constant 0 : i32
    %c0_i32_1 = arith.constant 0 : i32
    return %arg0, %c0_i32, %c0_i32_0 : i32, i32, i32
  }
  func.func @transform_1(%arg0: i32) -> (i32, i32) {
    %c0_i32 = arith.constant 0 : i32
    %c0_i32_0 = arith.constant 0 : i32
    %c0_i32_1 = arith.constant 0 : i32
    return %c0_i32, %c0_i32_0 : i32, i32
  }
  func.func @transform_2(%arg0: i32) -> (i32, i32) {
    %c0_i32 = arith.constant 0 : i32
    %c0_i32_0 = arith.constant 0 : i32
    %c0_i32_1 = arith.constant 0 : i32
    return %c0_i32, %c0_i32_0 : i32, i32
  }
  func.func @transform_3(%arg0: i32) -> (i32, i32) {
    %c0_i32 = arith.constant 0 : i32
    %c0_i32_0 = arith.constant 0 : i32
    %c0_i32_1 = arith.constant 0 : i32
    return %c0_i32, %c0_i32_0 : i32, i32
  }
  func.func @transform_4(%arg0: i32) -> (i32, i32) {
    %c0_i32 = arith.constant 0 : i32
    %c0_i32_0 = arith.constant 0 : i32
    %c0_i32_1 = arith.constant 0 : i32
    return %c0_i32, %c0_i32_0 : i32, i32
  }
  func.func @transform_5(%arg0: i32) -> (i32, i32) {
    %c0_i32 = arith.constant 0 : i32
    %c0_i32_0 = arith.constant 0 : i32
    %c0_i32_1 = arith.constant 0 : i32
    return %c0_i32, %c0_i32_0 : i32, i32
  }
  func.func @transform_6(%arg0: i32) -> (i32, i32) {
    %c0_i32 = arith.constant 0 : i32
    %c0_i32_0 = arith.constant 0 : i32
    %c0_i32_1 = arith.constant 0 : i32
    return %c0_i32, %c0_i32_0 : i32, i32
  }
  func.func @transform_7(%arg0: i32) -> (i32, i32) {
    %c0_i32 = arith.constant 0 : i32
    %c0_i32_0 = arith.constant 0 : i32
    %c0_i32_1 = arith.constant 0 : i32
    return %c0_i32, %c0_i32_0 : i32, i32
  }
  func.func @transform_8(%arg0: i32) -> (i32, i32) {
    %c0_i32 = arith.constant 0 : i32
    %c0_i32_0 = arith.constant 0 : i32
    %c0_i32_1 = arith.constant 0 : i32
    return %c0_i32, %c0_i32_0 : i32, i32
  }
  func.func @transform_9(%arg0: i32) -> (i32, i32, i32) {
    %c0_i32 = arith.constant 0 : i32
    %c0_i32_0 = arith.constant 0 : i32
    %c0_i32_1 = arith.constant 0 : i32
    return %arg0, %c0_i32, %c0_i32_0 : i32, i32, i32
  }
}

</mosaic_0001>

<bundles_post_ra>
// kernel: tiny_vit_block_forward.3
= control target key start
LH: loop header
LB: loop body
LE: loop exit
PB: predicated region body
PF: predicated region fallthrough
CT: control target
= control target key end

     0   :  { %s1515_s30 = smov 0   ;;  %s1936_s0 = inlined_call_operand.vmem [shape: f32[8,16,32], index: 0, kind: input, shape index: {}]   ;;  %s1937_s1 = inlined_call_operand.vmem [shape: f32[9,32], index: 1, kind: input, shape index: {}]   ;;  %s1938_s2 = inlined_call_operand.vmem [shape: f32[1,32], index: 2, kind: input, shape index: {}]   ;;  %s1939_s3 = inlined_call_operand.vmem [shape: f32[1,32], index: 3, kind: input, shape index: {}]   ;;  %s1940_s4 = inlined_call_operand.vmem [shape: f32[1,32], index: 4, kind: input, shape index: {}]   ;;  %s1941_s5 = inlined_call_operand.vmem [shape: f32[32,128], index: 5, kind: input, shape index: {}]   ;;  %s1942_s6 = inlined_call_operand.vmem [shape: f32[1,128], index: 6, kind: input, shape index: {}]   ;;  %s1943_s7 = inlined_call_operand.vmem [shape: f32[128,32], index: 7, kind: input, shape index: {}]   ;;  %s1944_s8 = inlined_call_operand.vmem [shape: f32[1,32], index: 8, kind: input, shape index: {}]   ;;  %s1945_s9 = inlined_call_operand.vmem [shape: f32[2,64,32], index: 9, kind: output, shape index: {}]  }
   0x1 LB: > { %s1521_s10 = sadd.s32 4294967295, %s1462_s30   ;;  %p1215_p0 = scmp.ge.s32.totalorder %s1462_s30, 1  ;;  %s1462_s30 = sphi %s1515_s30, %s19_s30  }
   0x2   : > { %p289_p1 = scmp.lt.s32.totalorder %s1462_s30, 3 }
   0x4   : > { %p290_p2 = pnand %p1215_p0, %p289_p1 }
   0x5   : > { %s1216_s11 = sshll.u32 (!%p290_p2), %s1521_s10, 2  ;;  %vm392_vm0 = vcmask (!%p290_p2), 261120   ;;  %vm394_vm1 = vcmask (!%p290_p2), 254976   ;;  %v1464_v0 = vmov (!%p290_p2), 0.0   ;;  %vm399_vm2 = vcmask (!%p290_p2), 253952   ;;  %p333_p4 = scmp.lt.s32.totalorder (!%p290_p2), %s1521_s10, 1 }
   0x6   : > { %293 = sbr.rel (%p290_p2) target bundleno = 837 (0x345), region = 56  ;;  %p1528_p3 = scmp.lt.s32.totalorder (!%p290_p2), %s1216_s11, 7  ;;  %393 = vst.msk [vmem:[#allocation2] sm:$0xff] (!%p290_p2), %vm392_vm0, %v1464_v0  ;;  %397 = vst.msk [vmem:[#allocation2 + $0x90] sm:$0xff] (!%p290_p2), %vm392_vm0, %v1464_v0  ;;  %vm347_vm3 = vcmask (!%p290_p2), 257024  }
   0x7   : > { %395 = vst.msk [vmem:[#allocation2 + $0x8] sm:$0x3] (!%p290_p2), %vm394_vm1, %v1464_v0  ;;  %398 = vst.msk [vmem:[#allocation2 + $0x98] sm:$0x3] (!%p290_p2), %vm394_vm1, %v1464_v0  ;;  %v1566_v1 = vld [vmem:[%s1937_s1] ss:$0 sm:$0xff] (!%p290_p2) }
   0x8   : > { %400 = vst.msk [vmem:[#allocation2] sm:$0x1] (!%p290_p2), %vm399_vm2, %v1464_v0  ;;  %401 = vst.msk [vmem:[#allocation2 + $0x10] sm:$0x1] (!%p290_p2), %vm399_vm2, %v1464_v0  ;;  %v1571_v2 = vld [vmem:[%s1937_s1 + $0x1] ss:$0 sm:$0xff] (!%p290_p2) }
   0x9   : > { %402 = vst.msk [vmem:[#allocation2 + $0x20] sm:$0x1] (!%p290_p2), %vm399_vm2, %v1464_v0  ;;  %410 = vst.msk [vmem:[#allocation2 + $0x9] sm:$0x1] (!%p290_p2), %vm399_vm2, %v1464_v0  ;;  %v1576_v3 = vld [vmem:[%s1937_s1 + $0x2] ss:$0 sm:$0xff] (!%p290_p2) }
   0xa   : > { %411 = vst.msk [vmem:[#allocation2 + $0x19] sm:$0x1] (!%p290_p2), %vm399_vm2, %v1464_v0  ;;  %412 = vst.msk [vmem:[#allocation2 + $0x29] sm:$0x1] (!%p290_p2), %vm399_vm2, %v1464_v0  ;;  %v1606_v27 = vld [vmem:[%s1937_s1 + $0x3] ss:$0 sm:$0xff] (!%p290_p2) }
   0xb   : > { %403 = vst.msk [vmem:[#allocation2 + $0x30] sm:$0x1] (!%p290_p2), %vm399_vm2, %v1464_v0  ;;  %404 = vst.msk [vmem:[#allocation2 + $0x40] sm:$0x1] (!%p290_p2), %vm399_vm2, %v1464_v0  ;;  %v1611_v28 = vld [vmem:[%s1937_s1 + $0x4] ss:$0 sm:$0xff] (!%p290_p2) }
   0xc   : > { %405 = vst.msk [vmem:[#allocation2 + $0x50] sm:$0x1] (!%p290_p2), %vm399_vm2, %v1464_v0  ;;  %406 = vst.msk [vmem:[#allocation2 + $0x60] sm:$0x1] (!%p290_p2), %vm399_vm2, %v1464_v0  ;;  %v1618_v30 = vld [vmem:[%s1937_s1 + $0x5] ss:$0 sm:$0xff] (!%p290_p2) }
   0xd   : > { %407 = vst.msk [vmem:[#allocation2 + $0x70] sm:$0x1] %vm399_vm2, %v1464_v0  ;;  %408 = vst.msk [vmem:[#allocation2 + $0x80] sm:$0x1] %vm399_vm2, %v1464_v0  ;;  %s1948_s11 = smov (!%p1528_p3, %s1216_s11), 7  ;;  %s1950_s10 = smov (!%p333_p4, %s1521_s10), 1 }
   0xe   : > { %413 = vst.msk [vmem:[#allocation2 + $0x39] sm:$0x1] %vm399_vm2, %v1464_v0  ;;  %414 = vst.msk [vmem:[#allocation2 + $0x49] sm:$0x1] %vm399_vm2, %v1464_v0  ;;  %s1251_s13 = sshll.u32 %s1948_s11, 4  ;;  %v449_v9 = vld [vmem:[#allocation2 + $0x1] sm:$0xff] }
   0xf   : > { %415 = vst.msk [vmem:[#allocation2 + $0x59] sm:$0x1] %vm399_vm2, %v1464_v0  ;;  %416 = vst.msk [vmem:[#allocation2 + $0x69] sm:$0x1] %vm399_vm2, %v1464_v0  ;;  %s1561_s16 = scalar_lea.vmem %s1936_s0, %s1251_s13  ;;  %v420_v13 = vld [vmem:[#allocation2] sm:$0xff]  ;;  %v462_v14 = vmul.f32 %v1571_v2, %v449_v9  ;;  %s1252_s28 = sshll.u32 %s1950_s10, 6 }
  0x10   : > { %417 = vst.msk [vmem:[#allocation2 + $0x79] sm:$0x1] %vm399_vm2, %v1464_v0  ;;  %418 = vst.msk [vmem:[#allocation2 + $0x89] sm:$0x1] %vm399_vm2, %v1464_v0  ;;  %v338_v4 = vld [vmem:[%s1561_s16] sm:$0xff]  ;;  %v1221_v5 = vld [vmem:[%s1561_s16 + $0x10] sm:$0xff]  ;;  %v433_v19 = vmul.f32 %v1566_v1, %v420_v13  ;;  %s337_s12 = scalar_lea.vmem %s1945_s9, %s1252_s28 }
  0x11   : > { %409 = vst.msk [vmem:[#allocation2 + $0x90] sm:$0x1] %vm399_vm2, %v1464_v0  ;;  %419 = vst.msk [vmem:[#allocation2 + $0x99] sm:$0x1] %vm399_vm2, %v1464_v0  ;;  %v339_v6 = vld [vmem:[%s1561_s16 + $0x8] sm:$0xff]  ;;  %v342_v7 = vcombine.high %v338_v4, %v338_v4  ;;  %v357_v8 = vcombine.high %v1221_v5, %v1221_v5  ;;  %v1222_v10 = vld [vmem:[%s1561_s16 + $0x18] sm:$0xff] }
  0x12   : > { %348 = vst.msk [vmem:[#allocation2 + $0x11] sm:$0xf] %vm347_vm3, %v338_v4  ;;  %361 = vst.msk [vmem:[#allocation2 + $0x15] sm:$0xf] %vm347_vm3, %v1221_v5  ;;  %v343_v11 = vcombine.high %v339_v6, %v339_v6  ;;  %v1223_v12 = vld [vmem:[%s1561_s16 + $0x20] sm:$0xff]  ;;  %v358_v16 = vcombine.high %v1222_v10, %v1222_v10  ;;  %v1225_v18 = vld [vmem:[%s1561_s16 + $0x30] sm:$0xff]  ;;  %v470_v26 = vadd.f32 %v462_v14, %v433_v19 }
  0x13   : > { %350 = vst.msk [vmem:[#allocation2 + $0x31] sm:$0xf] %vm347_vm3, %v339_v6  ;;  %v478_v15 = vld [vmem:[#allocation2 + $0x2] sm:$0xff]  ;;  %363 = vst.msk [vmem:[#allocation2 + $0x35] sm:$0xf] %vm347_vm3, %v1222_v10  ;;  %v370_v17 = vcombine.high %v1223_v12, %v1223_v12  ;;  %v384_v21 = vcombine.high %v1225_v18, %v1225_v18  ;;  %v1226_v23 = vld [vmem:[%s1561_s16 + $0x38] sm:$0xff] }
  0x14   : > { %375 = vst.msk [vmem:[#allocation2 + $0x51] sm:$0xf] %vm347_vm3, %v1223_v12  ;;  %349 = vst.msk [vmem:[#allocation2 + $0x21] sm:$0xf] %vm347_vm3, %v342_v7  ;;  %v491_v20 = vmul.f32 %v1576_v3, %v478_v15  ;;  %v1224_v22 = vld [vmem:[%s1561_s16 + $0x28] sm:$0xff]  ;;  %v385_v25 = vcombine.high %v1226_v23, %v1226_v23 }
  0x15   : > { %362 = vst.msk [vmem:[#allocation2 + $0x25] sm:$0xf] %vm347_vm3, %v357_v8  ;;  %351 = vst.msk [vmem:[#allocation2 + $0x41] sm:$0xf] %vm347_vm3, %v343_v11  ;;  %v371_v24 = vcombine.high %v1224_v22, %v1224_v22  ;;  %v1625_v36 = vld [vmem:[%s1937_s1 + $0x6] ss:$0 sm:$0xff] }
  0x16   : > { %388 = vst.msk [vmem:[#allocation2 + $0x55] sm:$0xf] %vm347_vm3, %v1225_v18  ;;  %364 = vst.msk [vmem:[#allocation2 + $0x45] sm:$0xf] %vm347_vm3, %v358_v16  ;;  %v499_v29 = vadd.f32 %v491_v20, %v470_v26  ;;  %v1630_v37 = vld [vmem:[%s1937_s1 + $0x7] ss:$0 sm:$0xff] }
  0x17   : > { %376 = vst.msk [vmem:[#allocation2 + $0x61] sm:$0xf] %vm347_vm3, %v370_v17  ;;  %377 = vst.msk [vmem:[#allocation2 + $0x71] sm:$0xf] %vm347_vm3, %v1224_v22  ;;  %v1639_v47 = vld [vmem:[%s1937_s1 + $0x8] ss:$0 sm:$0xff] }
  0x18   : > { %390 = vst.msk [vmem:[#allocation2 + $0x75] sm:$0xf] %vm347_vm3, %v1226_v23  ;;  %389 = vst.msk [vmem:[#allocation2 + $0x65] sm:$0xf] %vm347_vm3, %v384_v21 }
  0x19   : > { %378 = vst.msk [vmem:[#allocation2 + $0x81] sm:$0xf] %vm347_vm3, %v371_v24  ;;  %391 = vst.msk [vmem:[#allocation2 + $0x85] sm:$0xf] %vm347_vm3, %v385_v25  ;;  %v507_v31 = vld [vmem:[#allocation2 + $0x10] sm:$0xff] }
  0x1a   : > { %v536_v32 = vld [vmem:[#allocation2 + $0x11] sm:$0xff]  ;;  %v520_v34 = vmul.f32 %v1606_v27, %v507_v31  ;;  %v434_v38 = vmul.f32 %v1566_v1, %v507_v31 }
  0x1b   : > { %v565_v33 = vld [vmem:[#allocation2 + $0x12] sm:$0xff]  ;;  %v549_v35 = vmul.f32 %v1611_v28, %v536_v32  ;;  %v463_v41 = vmul.f32 %v1571_v2, %v536_v32 }
  0x1c   : > { %v595_v39 = vld [vmem:[#allocation2 + $0x20] sm:$0xff]  ;;  %v492_v42 = vmul.f32 %v1576_v3, %v565_v33  ;;  %v596_v43 = vld [vmem:[#allocation2 + $0x30] sm:$0xff]  ;;  %v528_v44 = vadd.f32 %v520_v34, %v499_v29  ;;  %v578_v45 = vmul.f32 %v1618_v30, %v565_v33 }
  0x1d   : > { %v624_v40 = vld [vmem:[#allocation2 + $0x21] sm:$0xff]  ;;  %v609_v48 = vmul.f32 %v1625_v36, %v596_v43  ;;  %v625_v49 = vld [vmem:[#allocation2 + $0x31] sm:$0xff]  ;;  %v608_v50 = vmul.f32 %v1625_v36, %v595_v39  ;;  %v471_v51 = vadd.f32 %v463_v41, %v434_v38  ;;  %v521_v52 = vmul.f32 %v1606_v27, %v595_v39  ;;  %v1668_v29 = vld [vmem:[%s1938_s2] ss:$0 sm:$0xff] }
  0x1e   : > { %v653_v46 = vld [vmem:[#allocation2 + $0x22] sm:$0xff]  ;;  %v638_v53 = vmul.f32 %v1630_v37, %v625_v49  ;;  %v557_v54 = vadd.f32 %v549_v35, %v528_v44  ;;  %v637_v55 = vmul.f32 %v1630_v37, %v624_v40  ;;  %v435_v56 = vmul.f32 %v1566_v1, %v595_v39  ;;  %v654_v6 = vld [vmem:[#allocation2 + $0x32] sm:$0xff] }
  0x1f   : > { %v464_v57 = vmul.f32 %v1571_v2, %v624_v40  ;;  %v597_v58 = vld [vmem:[#allocation2 + $0x40] sm:$0xff]  ;;  %v666_v59 = vmul.f32 %v1639_v47, %v653_v46  ;;  %v500_v60 = vadd.f32 %v492_v42, %v471_v51  ;;  %v550_v61 = vmul.f32 %v1611_v28, %v624_v40  ;;  %v1656_v13 = vld [vmem:[#allocation2 + $0x50] sm:$0xff] }
  0x20   : > { %v493_v62 = vmul.f32 %v1576_v3, %v653_v46  ;;  %v626_v63 = vld [vmem:[#allocation2 + $0x41] sm:$0xff]  ;;  %v586_v4 = vadd.f32 %v578_v45, %v557_v54  ;;  %v579_v5 = vmul.f32 %v1618_v30, %v653_v46  ;;  %v522_v8 = vmul.f32 %v1606_v27, %v596_v43  ;;  %v540_v26 = vld [vmem:[#allocation2 + $0x51] sm:$0xff] }
  0x21   : > { %v655_v0 = vld [vmem:[#allocation2 + $0x42] sm:$0xff]  ;;  %v472_v7 = vadd.f32 %v464_v57, %v435_v56  ;;  %v529_v9 = vadd.f32 %v521_v52, %v500_v60  ;;  %v667_v10 = vmul.f32 %v1639_v47, %v654_v6  ;;  %v551_v11 = vmul.f32 %v1611_v28, %v625_v49  ;;  %v569_v40 = vld [vmem:[#allocation2 + $0x52] sm:$0xff] }
  0x22   : > { %v437_v12 = vmul.f32 %v1566_v1, %v597_v58  ;;  %v616_v14 = vadd.f32 %v608_v50, %v586_v4  ;;  %v466_v16 = vmul.f32 %v1571_v2, %v626_v63  ;;  %v495_v17 = vmul.f32 %v1576_v3, %v655_v0  ;;  %v599_v54 = vld [vmem:[#allocation2 + $0x60] sm:$0xff]  ;;  %v1687_v4 = vld [vmem:[#allocation2 + $0x70] sm:$0xff] }
  0x23   : > { %v501_v15 = vadd.f32 %v493_v62, %v472_v7  ;;  %v558_v18 = vadd.f32 %v550_v61, %v529_v9  ;;  %v580_v19 = vmul.f32 %v1618_v30, %v654_v6  ;;  %v610_v20 = vmul.f32 %v1625_v36, %v597_v58 }
  0x24   : > { %v639_v21 = vmul.f32 %v1630_v37, %v626_v63  ;;  %v645_v22 = vadd.f32 %v637_v55, %v616_v14  ;;  %v474_v24 = vadd.f32 %v466_v16, %v437_v12  ;;  %v524_v25 = vmul.f32 %v1606_v27, %v1656_v13 }
  0x25   : > { %v530_v23 = vadd.f32 %v522_v8, %v501_v15  ;;  %v587_v31 = vadd.f32 %v579_v5, %v558_v18  ;;  %v668_v32 = vmul.f32 %v1639_v47, %v655_v0  ;;  %v553_v33 = vmul.f32 %v1611_v28, %v540_v26 }
  0x26   : > { %v436_v34 = vmul.f32 %v1566_v1, %v596_v43  ;;  %v674_v35 = vadd.f32 %v666_v59, %v645_v22  ;;  %v503_v39 = vadd.f32 %v495_v17, %v474_v24  ;;  %v465_v41 = vmul.f32 %v1571_v2, %v625_v49  ;;  %v628_v43 = vld [vmem:[#allocation2 + $0x61] sm:$0xff]  ;;  %v571_v24 = vld [vmem:[#allocation2 + $0x72] sm:$0xff] }
  0x27   : > { %v559_v38 = vadd.f32 %v551_v11, %v530_v23  ;;  %v617_v42 = vadd.f32 %v609_v48, %v587_v31  ;;  %v582_v44 = vmul.f32 %v1618_v30, %v569_v40  ;;  %v494_v45 = vmul.f32 %v1576_v3, %v654_v6  ;;  %v1682_v48 = vld [vmem:[#allocation2 + $0x62] sm:$0xff] }
  0x28   : > { %v523_v46 = vmul.f32 %v1606_v27, %v597_v58  ;;  %v1678_v50 = vadd.f32 %v1668_v29, %v674_v35  ;;  %v532_v52 = vadd.f32 %v524_v25, %v503_v39  ;;  %v473_v55 = vadd.f32 %v465_v41, %v436_v34 }
  0x29   : > { %v588_v51 = vadd.f32 %v580_v19, %v559_v38  ;;  %v646_v56 = vadd.f32 %v638_v53, %v617_v42  ;;  %v612_v57 = vmul.f32 %v1625_v36, %v599_v54  ;;  %v641_v49 = vmul.f32 %v1630_v37, %v628_v43  ;;  %v542_v19 = vld [vmem:[#allocation2 + $0x71] sm:$0xff] }
  0x2a   : > { %v552_v59 = vmul.f32 %v1611_v28, %v626_v63  ;;  %v699_v58 = vsel %vm392_vm0, %v1678_v50, 0.0  ;;  %v561_v61 = vadd.f32 %v553_v33, %v532_v52  ;;  %v502_v62 = vadd.f32 %v494_v45, %v473_v55  ;;  %v630_v55 = vld [vmem:[#allocation2 + $0x81] sm:$0xff] }
  0x2b   : > { %v618_v60 = vadd.f32 %v610_v20, %v588_v51  ;;  %700 = vadd.xlane.f32.xlu0 %v699_v58  ;;  %v675_v5 = vadd.f32 %v667_v10, %v646_v56  ;;  %v581_v53 = vmul.f32 %v1618_v30, %v655_v0  ;;  %v439_v6 = vmul.f32 %v1566_v1, %v599_v54 }
  0x2c   : > { %v468_v7 = vmul.f32 %v1571_v2, %v628_v43  ;;  %v590_v9 = vadd.f32 %v582_v44, %v561_v61  ;;  %v531_v11 = vadd.f32 %v523_v46, %v502_v62  ;;  %v497_v63 = vmul.f32 %v1576_v3, %v1682_v48  ;;  %v601_v46 = vld [vmem:[#allocation2 + $0x80] sm:$0xff] }
  0x2d   : > { %v647_v8 = vadd.f32 %v639_v21, %v618_v60  ;;  %v1695_v12 = vadd.f32 %v1668_v29, %v675_v5  ;;  %v670_v14 = vmul.f32 %v1639_v47, %v1682_v48  ;;  %v526_v0 = vmul.f32 %v1606_v27, %v1687_v4  ;;  %v659_v5 = vld [vmem:[#allocation2 + $0x82] sm:$0xff] }
  0x2e   : > { %v476_v15 = vadd.f32 %v468_v7, %v439_v6  ;;  %v620_v16 = vadd.f32 %v612_v57, %v590_v9  ;;  %v560_v17 = vadd.f32 %v552_v59, %v531_v11  ;;  %v611_v18 = vmul.f32 %v1625_v36, %v1656_v13 }
  0x2f   : > { %v676_v10 = vadd.f32 %v668_v32, %v647_v8  ;;  %v702_v20 = vsel %vm392_vm0, %v1695_v12, 0.0  ;;  %v640_v21 = vmul.f32 %v1630_v37, %v540_v26  ;;  %v555_v23 = vmul.f32 %v1611_v28, %v542_v19 }
  0x30   : > { %v505_v22 = vadd.f32 %v497_v63, %v476_v15  ;;  %703 = vadd.xlane.f32.xlu0 %v702_v20  ;;  %v649_v31 = vadd.f32 %v641_v49, %v620_v16  ;;  %v589_v32 = vadd.f32 %v581_v53, %v560_v17  ;;  %v584_v33 = vmul.f32 %v1618_v30, %v571_v24  ;;  %v602_v17 = vld [vmem:[#allocation2 + $0x90] sm:$0xff] }
  0x31   : > { %v1708_v25 = vadd.f32 %v1668_v29, %v676_v10  ;;  %v438_v35 = vmul.f32 %v1566_v1, %v1656_v13  ;;  %v467_v38 = vmul.f32 %v1571_v2, %v540_v26  ;;  %v496_v39 = vmul.f32 %v1576_v3, %v569_v40 }
  0x32   : > { %v534_v34 = vadd.f32 %v526_v0, %v505_v22  ;;  %v678_v42 = vadd.f32 %v670_v14, %v649_v31  ;;  %v619_v44 = vadd.f32 %v611_v18, %v589_v32  ;;  %v669_v45 = vmul.f32 %v1639_v47, %v569_v40  ;;  %v631_v22 = vld [vmem:[#allocation2 + $0x91] sm:$0xff] }
  0x33   : > { %v705_v41 = vsel %vm392_vm0, %v1708_v25, 0.0  ;;  %v614_v52 = vmul.f32 %v1625_v36, %v601_v46  ;;  %v475_v56 = vadd.f32 %v467_v38, %v438_v35  ;;  %v525_v13 = vmul.f32 %v1606_v27, %v599_v54 }
  0x34   : > { %706 = vadd.xlane.f32.xlu1 %v705_v41  ;;  %v563_v51 = vadd.f32 %v555_v23, %v534_v34  ;;  %v1721_v26 = vadd.f32 %v1668_v29, %v678_v42  ;;  %v648_v57 = vadd.f32 %v640_v21, %v619_v44  ;;  %v643_v49 = vmul.f32 %v1630_v37, %v630_v55 }
  0x35   : > { %v504_v58 = vadd.f32 %v496_v39, %v475_v56  ;;  %v554_v60 = vmul.f32 %v1611_v28, %v628_v43  ;;  %v440_v40 = vmul.f32 %v1566_v1, %v1687_v4  ;;  %v469_v54 = vmul.f32 %v1571_v2, %v542_v19 }
  0x36   : > { %v592_v59 = vadd.f32 %v584_v33, %v563_v51  ;;  %v711_v61 = vsel %vm392_vm0, %v1721_v26, 0.0  ;;  %v677_v62 = vadd.f32 %v669_v45, %v648_v57  ;;  %v498_v53 = vmul.f32 %v1576_v3, %v571_v24  ;;  %v660_v33 = vld [vmem:[#allocation2 + $0x92] sm:$0xff] }
  0x37   : > { %712 = vadd.xlane.f32.xlu0 %v711_v61  ;;  %v672_v7 = vmul.f32 %v1639_v47, %v659_v5  ;;  %v533_v8 = vadd.f32 %v525_v13, %v504_v58  ;;  %v583_v43 = vmul.f32 %v1618_v30, %v1682_v48  ;;  %v477_v1 = vadd.f32 %v469_v54, %v440_v40 }
  0x38   : > { %v622_v6 = vadd.f32 %v614_v52, %v592_v59  ;;  %v1735_v9 = vadd.f32 %v1668_v29, %v677_v62  ;;  %v527_v11 = vmul.f32 %v1606_v27, %v601_v46  ;;  %v613_v2 = vmul.f32 %v1625_v36, %v1687_v4 }
  0x39   : > { %v562_v14 = vadd.f32 %v554_v60, %v533_v8  ;;  %v506_v15 = vadd.f32 %v498_v53, %v477_v1  ;;  %v556_v0 = vmul.f32 %v1611_v28, %v630_v55  ;;  %v642_v16 = vmul.f32 %v1630_v37, %v542_v19 }
  0x3a   : > { %v651_v63 = vadd.f32 %v643_v49, %v622_v6  ;;  %v708_v3 = vsel %vm392_vm0, %v1735_v9, 0.0  ;;  %v585_v27 = vmul.f32 %v1618_v30, %v659_v5  ;;  %v671_v4 = vmul.f32 %v1639_v47, %v571_v24 }
  0x3b   : > { %709 = vadd.xlane.f32.xlu1 %v708_v3  ;;  %v591_v48 = vadd.f32 %v583_v43, %v562_v14  ;;  %v535_v18 = vadd.f32 %v527_v11, %v506_v15  ;;  %v615_v31 = vmul.f32 %v1625_v36, %v602_v17  ;;  %v644_v34 = vmul.f32 %v1630_v37, %v631_v22  ;;  %v833_v22 = vld [vmem:[%s1941_s5 + $0x8] sm:$0xff] }
  0x3c   : > { %v680_v10 = vadd.f32 %v672_v7, %v651_v63  ;;  %v673_v38 = vmul.f32 %v1639_v47, %v660_v33  ;;  %v1012_v33 = vld [vmem:[%s1943_s7] sm:$0xff] }
  0x3d   : > { %v621_v21 = vadd.f32 %v613_v2, %v591_v48  ;;  %v564_v23 = vadd.f32 %v556_v0, %v535_v18 }
  0x3e   : > { %v1746_v20 = vadd.f32 %v1668_v29, %v680_v10 }
  0x3f   : > { %v650_v32 = vadd.f32 %v642_v16, %v621_v21  ;;  %v593_v19 = vadd.f32 %v585_v27, %v564_v23 }
  0x40   : > { %v717_v28 = vsel %vm392_vm0, %v1746_v20, 0.0 }
  0x41   : > { %718 = vadd.xlane.f32.xlu0 %v717_v28  ;;  %v679_v30 = vadd.f32 %v671_v4, %v650_v32  ;;  %v623_v35 = vadd.f32 %v615_v31, %v593_v19  ;;  %v832_v4 = vld [vmem:[%s1941_s5] sm:$0xff]  ;;  %v834_v31 = vld [vmem:[%s1941_s5 + $0x10] sm:$0xff]  ;;  %v835_v28 = vld [vmem:[%s1941_s5 + $0x18] sm:$0xff] }
  0x42   : > { %v1353_v23 = vpack.c.bf16 %v833_v22, %v832_v4  ;;  %v1357_v32 = vpack.c.bf16 %v835_v28, %v834_v31  ;;  %v1013_v19 = vld [vmem:[%s1943_s7 + $0x8] sm:$0xff] }
  0x43   : > { %v1755_v39 = vadd.f32 %v1668_v29, %v679_v30  ;;  %v652_v24 = vadd.f32 %v644_v34, %v623_v35  ;;  %v1014_v34 = vld [vmem:[%s1943_s7 + $0x10] sm:$0xff]  ;;  %v1361_v30 = vpack.c.bf16 %v1013_v19, %v1012_v33  ;;  %v1015_v35 = vld [vmem:[%s1943_s7 + $0x18] sm:$0xff] }
  0x44   : > { %1354 = vmatprep.subr.bf16.mxu0 %v1353_v23 }
  0x45   : > { %v714_v36 = vsel %vm392_vm0, %v1755_v39, 0.0  ;;  %v681_v41 = vadd.f32 %v673_v38, %v652_v24  ;;  %1356 = vmatpush3.bf16.msra.mxu0 %v1353_v23  ;;  %v1836_v38 = vpack.c.bf16 %v1015_v35, %v1014_v34  ;;  %1393 = vmatprep.subr.bf16.mxu1 %v1361_v30  ;;  %v1016_v24 = vld [vmem:[%s1943_s7 + $0x20] sm:$0xff] }
  0x46   : > { %715 = vadd.xlane.f32.xlu1 %v714_v36  ;;  %1358 = vmatprep.subr.bf16.mxu0 %v1357_v32  ;;  %v1017_v36 = vld [vmem:[%s1943_s7 + $0x28] sm:$0xff] }
  0x47   : > { %v1760_v42 = vadd.f32 %v1668_v29, %v681_v41  ;;  %1401 = vmatpush3.bf16.msra.mxu1 %v1361_v30  ;;  %v1845_v41 = vpack.c.bf16 %v1017_v36, %v1016_v24 }
  0x48   : > { %1394 = vmatprep.subr.bf16.mxu1 %v1836_v38 }
  0x49   : > { %v720_v44 = vsel %vm392_vm0, %v1760_v42, 0.0  ;;  %1360 = vmatpush3.bf16.msra.mxu0 %v1357_v32 }
  0x4a   : > { %721 = vadd.xlane.f32.xlu1 %v720_v44  ;;  %1362 = vmatprep.subr.bf16.mxu0 %v1361_v30 }
  0x4b   : > { %1402 = vmatpush3.bf16.msra.mxu1 %v1836_v38 }
  0x4c   : > { %1395 = vmatprep.subr.bf16.mxu1 %v1845_v41 }
  0x4f   : > { %1403 = vmatpush3.bf16.msra.mxu1 %v1845_v41 }
  0xb8   : > { %v701_v37 = vpop.xlane.xlu0 %700 }
  0xb9   : > { %v724_v45 = vmul.f32 0.03125, %v701_v37 }
  0xbb   : > { %v1765_v47 = vsub.f32 %v1678_v50, %v724_v45 }
  0xbd   : > { %v704_v46 = vpop.xlane.xlu0 %703  ;;  %v740_v51 = vmul.f32 %v1765_v47, %v1765_v47 }
  0xbe   : > { %v725_v52 = vmul.f32 0.03125, %v704_v46 }
  0xbf   : > { %v748_v55 = vsel %vm392_vm0, %v740_v51, 0.0 }
  0xc0   : > { %v1771_v56 = vsub.f32 %v1695_v12, %v725_v52  ;;  %749 = vadd.xlane.f32.xlu0 %v748_v55 }
  0xc1   : > { %v707_v29 = vpop.xlane.xlu1 %706 }
  0xc2   : > { %v726_v13 = vmul.f32 0.03125, %v707_v29  ;;  %v741_v57 = vmul.f32 %v1771_v56, %v1771_v56 }
  0xc4   : > { %v1776_v49 = vsub.f32 %v1708_v25, %v726_v13  ;;  %v713_v59 = vpop.xlane.xlu0 %712  ;;  %v751_v58 = vsel %vm392_vm0, %v741_v57, 0.0 }
  0xc5   : > { %v728_v60 = vmul.f32 0.03125, %v713_v59  ;;  %752 = vadd.xlane.f32.xlu1 %v751_v58 }
  0xc6   : > { %v742_v40 = vmul.f32 %v1776_v49, %v1776_v49 }
  0xc7   : > { %v1782_v61 = vsub.f32 %v1721_v26, %v728_v60 }
  0xc8   : > { %v754_v62 = vsel %vm392_vm0, %v742_v40, 0.0  ;;  %v710_v5 = vpop.xlane.xlu1 %709  ;;  %v1237_v40 = vld [vmem:[%s1939_s3] ss:$0 sm:$0xff] }
  0xc9   : > { %755 = vadd.xlane.f32.xlu0 %v754_v62  ;;  %v727_v54 = vmul.f32 0.03125, %v710_v5  ;;  %v744_v53 = vmul.f32 %v1782_v61, %v1782_v61 }
  0xcb   : > { %v1788_v6 = vsub.f32 %v1735_v9, %v727_v54  ;;  %v760_v7 = vsel %vm392_vm0, %v744_v53, 0.0  ;;  %v1238_v53 = vld [vmem:[%s1940_s4] ss:$0 sm:$0xff] }
  0xcd   : > { %761 = vadd.xlane.f32.xlu0 %v760_v7  ;;  %v743_v43 = vmul.f32 %v1788_v6, %v1788_v6 }
  0xce   : > { %v719_v8 = vpop.xlane.xlu0 %718 }
  0xcf   : > { %v730_v1 = vmul.f32 0.03125, %v719_v8  ;;  %v757_v11 = vsel %vm392_vm0, %v743_v43, 0.0 }
  0xd0   : > { %758 = vadd.xlane.f32.xlu1 %v757_v11 }
  0xd1   : > { %v1795_v63 = vsub.f32 %v1746_v20, %v730_v1 }
  0xd3   : > { %v746_v14 = vmul.f32 %v1795_v63, %v1795_v63  ;;  %v716_v2 = vpop.xlane.xlu1 %715 }
  0xd4   : > { %v729_v3 = vmul.f32 0.03125, %v716_v2 }
  0xd5   : > { %v766_v15 = vsel %vm392_vm0, %v746_v14, 0.0 }
  0xd6   : > { %767 = vadd.xlane.f32.xlu0 %v766_v15  ;;  %v1801_v0 = vsub.f32 %v1755_v39, %v729_v3 }
  0xd7   : > { %v722_v10 = vpop.xlane.xlu1 %721 }
  0xd8   : > { %v745_v48 = vmul.f32 %v1801_v0, %v1801_v0  ;;  %v731_v16 = vmul.f32 0.03125, %v722_v10 }
  0xda   : > { %v763_v17 = vsel %vm392_vm0, %v745_v48, 0.0  ;;  %v1807_v18 = vsub.f32 %v1760_v42, %v731_v16 }
  0xdb   : > { %764 = vadd.xlane.f32.xlu1 %v763_v17 }
  0xdc   : > { %v747_v27 = vmul.f32 %v1807_v18, %v1807_v18 }
  0xde   : > { %v769_v21 = vsel %vm392_vm0, %v747_v27, 0.0 }
  0xdf   : > { %770 = vadd.xlane.f32.xlu1 %v769_v21 }
 0x14d   : > { %v750_v44 = vpop.xlane.xlu0 %749 }
 0x14e   : > { %v772_v37 = vmul.f32 0.03125, %v750_v44 }
 0x150   : > { %v780_v45 = vadd.f32 1e-05, %v772_v37 }
 0x152   : > { %1424 = vrsqrt.f32 %v780_v45  ;;  %v753_v46 = vpop.xlane.xlu1 %752 }
 0x153   : > { %v773_v51 = vmul.f32 0.03125, %v753_v46 }
 0x155   : > { %v781_v52 = vadd.f32 1e-05, %v773_v51 }
 0x156   : > { %v756_v55 = vpop.xlane.xlu0 %755 }
 0x157   : > { %v774_v29 = vmul.f32 0.03125, %v756_v55  ;;  %1426 = vrsqrt.f32 %v781_v52  ;;  %v1021_v55 = vld [vmem:[%s1943_s7 + $0x48] sm:$0xff] }
 0x159   : > { %v782_v13 = vadd.f32 1e-05, %v774_v29 }
 0x15a   : > { %v762_v57 = vpop.xlane.xlu0 %761 }
 0x15b   : > { %1428 = vrsqrt.f32 %v782_v13  ;;  %v776_v59 = vmul.f32 0.03125, %v762_v57  ;;  %v1022_v13 = vld [vmem:[%s1943_s7 + $0x50] sm:$0xff]  ;;  %v1023_v57 = vld [vmem:[%s1943_s7 + $0x58] sm:$0xff] }
 0x15c   : > { %v1425_v58 = vpop.eup %1424 }
 0x15d   : > { %v784_v60 = vadd.f32 1e-05, %v776_v59  ;;  %v759_v62 = vpop.xlane.xlu1 %758  ;;  %v796_v5 = vmul.f32 %v1425_v58, %v1765_v47  ;;  %v1381_v59 = vpack.c.bf16 %v1023_v57, %v1022_v13  ;;  %v1024_v58 = vld [vmem:[%s1943_s7 + $0x60] sm:$0xff] }
 0x15e   : > { %v775_v54 = vmul.f32 0.03125, %v759_v62  ;;  %v1026_v62 = vld [vmem:[%s1943_s7 + $0x70] sm:$0xff] }
 0x15f   : > { %1430 = vrsqrt.f32 %v784_v60  ;;  %v810_v7 = vmul.f32 %v1237_v40, %v796_v5  ;;  %v1025_v60 = vld [vmem:[%s1943_s7 + $0x68] sm:$0xff]  ;;  %v1027_v5 = vld [vmem:[%s1943_s7 + $0x78] sm:$0xff] }
 0x160   : > { %v783_v8 = vadd.f32 1e-05, %v775_v54  ;;  %v1389_v54 = vpack.c.bf16 %v1027_v5, %v1026_v62 }
 0x161   : > { %v1427_v43 = vpop.eup %1426  ;;  %v824_v1 = vadd.f32 %v1238_v53, %v810_v7 }
 0x162   : > { %1432 = vrsqrt.f32 %v783_v8  ;;  %v797_v14 = vmul.f32 %v1427_v43, %v1771_v56 }
 0x163   : > { %v768_v11 = vpop.xlane.xlu0 %767  ;;  %1297 = vmatprep.mubr.msk.f32.mxu0 %vm392_vm0, %v824_v1 }
 0x164   : > { %v778_v2 = vmul.f32 0.03125, %v768_v11  ;;  %v811_v15 = vmul.f32 %v1237_v40, %v797_v14 }
 0x165   : > { %v1429_v3 = vpop.eup %1428 }
 0x166   : > { %v786_v47 = vadd.f32 1e-05, %v778_v2  ;;  %v798_v10 = vmul.f32 %v1429_v3, %v1776_v49  ;;  %v825_v48 = vadd.f32 %v1238_v53, %v811_v15 }
 0x168   : > { %1434 = vrsqrt.f32 %v786_v47  ;;  %v812_v16 = vmul.f32 %v1237_v40, %v798_v10  ;;  %v765_v27 = vpop.xlane.xlu1 %764  ;;  %1298 = vmatmul.mubr.msk.f32.vlgmr.msra.gmra.mrb[0].mxu0 %vm392_vm0, %v825_v48 }
 0x169   : > { %v1431_v17 = vpop.eup %1430  ;;  %v777_v21 = vmul.f32 0.03125, %v765_v27  ;;  %1364 = vmatpush3.bf16.msra.mxu0 %v1361_v30 }
 0x16a   : > { %v826_v4 = vadd.f32 %v1238_v53, %v812_v16  ;;  %v800_v22 = vmul.f32 %v1431_v17, %v1782_v61  ;;  %1366 = vmatprep.subr.bf16.mxu0 %v1836_v38 }
 0x16b   : > { %v785_v56 = vadd.f32 1e-05, %v777_v21 }
 0x16c   : > { %1300 = vmatprep.mubr.msk.f32.mxu0 %vm392_vm0, %v826_v4  ;;  %v1433_v23 = vpop.eup %1432  ;;  %v814_v31 = vmul.f32 %v1237_v40, %v800_v22  ;;  %v771_v49 = vpop.xlane.xlu1 %770 }
 0x16d   : > { %1436 = vrsqrt.f32 %v785_v56  ;;  %v799_v28 = vmul.f32 %v1433_v23, %v1788_v6  ;;  %1368 = vmatpush3.bf16.msra.mxu0 %v1836_v38  ;;  %v779_v32 = vmul.f32 0.03125, %v771_v49 }
 0x16e   : > { %1370 = vmatprep.subr.bf16.mxu0 %v1845_v41  ;;  %v828_v61 = vadd.f32 %v1238_v53, %v814_v31 }
 0x16f   : > { %v813_v33 = vmul.f32 %v1237_v40, %v799_v28  ;;  %v787_v19 = vadd.f32 1e-05, %v779_v32 }
 0x171   : > { %v827_v30 = vadd.f32 %v1238_v53, %v813_v33  ;;  %1372 = vmatpush3.bf16.msra.mxu0 %v1845_v41  ;;  %1438 = vrsqrt.f32 %v787_v19 }
 0x172   : > { %v1435_v34 = vpop.eup %1434 }
 0x173   : > { %1301 = vmatmul.mubr.msk.f32.gmra.mrb[2].mxu0 %vm392_vm0, %v827_v30  ;;  %v802_v35 = vmul.f32 %v1435_v34, %v1795_v63  ;;  %v1018_v63 = vld [vmem:[%s1943_s7 + $0x30] sm:$0xff] }
 0x174   : > { %1303 = vmatprep.mubr.msk.f32.mxu0 %vm392_vm0, %v828_v61 }
 0x175   : > { %v816_v24 = vmul.f32 %v1237_v40, %v802_v35 }
 0x177   : > { %v1437_v6 = vpop.eup %1436  ;;  %v830_v44 = vadd.f32 %v1238_v53, %v816_v24 }
 0x178   : > { %v801_v38 = vmul.f32 %v1437_v6, %v1801_v0  ;;  %v1019_v0 = vld [vmem:[%s1943_s7 + $0x38] sm:$0xff] }
 0x179   : > { %v1373_v52 = vpack.c.bf16 %v1019_v0, %v1018_v63 }
 0x17a   : > { %v815_v36 = vmul.f32 %v1237_v40, %v801_v38 }
 0x17b   : > { %v1439_v37 = vpop.eup %1438  ;;  %1374 = vmatprep.subr.bf16.mxu0 %v1373_v52  ;;  %1396 = vmatprep.subr.bf16.mxu1 %v1373_v52 }
 0x17c   : > { %v829_v45 = vadd.f32 %v1238_v53, %v815_v36  ;;  %v803_v46 = vmul.f32 %v1439_v37, %v1807_v18  ;;  %1376 = vmatpush3.bf16.msra.mxu0 %v1373_v52  ;;  %v1020_v18 = vld [vmem:[%s1943_s7 + $0x40] sm:$0xff]  ;;  %1404 = vmatpush3.bf16.msra.mxu1 %v1373_v52 }
 0x17d   : > { %v1377_v29 = vpack.c.bf16 %v1021_v55, %v1020_v18 }
 0x17e   : > { %1304 = vmatmul.mubr.msk.f32.gmra.mrb[4].mxu0 %vm392_vm0, %v829_v45  ;;  %v817_v41 = vmul.f32 %v1237_v40, %v803_v46  ;;  %v1385_v40 = vpack.c.bf16 %v1025_v60, %v1024_v58 }
 0x17f   : > { %1306 = vmatprep.mubr.msk.f32.mxu0 %vm392_vm0, %v830_v44  ;;  %1378 = vmatprep.subr.bf16.mxu0 %v1377_v29 }
 0x180   : > { %v831_v51 = vadd.f32 %v1238_v53, %v817_v41  ;;  %1397 = vmatprep.subr.bf16.mxu1 %v1377_v29  ;;  %1380 = vmatpush3.bf16.msra.mxu0 %v1377_v29  ;;  %v1239_v53 = vld [vmem:[%s1942_s6] ss:$0 sm:$0xff] }
 0x181   : > { %1405 = vmatpush3.bf16.msra.mxu1 %v1377_v29  ;;  %1382 = vmatprep.subr.bf16.mxu0 %v1381_v59 }
 0x182   : > { %1307 = vmatmul.mubr.msk.f32.gmra.mrb[6].mxu0 %vm392_vm0, %v831_v51  ;;  %1398 = vmatprep.subr.bf16.mxu1 %v1381_v59 }
 0x184   : > { %1384 = vmatpush3.bf16.msra.mxu0 %v1381_v59 }
 0x185   : > { %1406 = vmatpush3.bf16.msra.mxu1 %v1381_v59  ;;  %1386 = vmatprep.subr.bf16.mxu0 %v1385_v40 }
 0x186   : > { %1399 = vmatprep.subr.bf16.mxu1 %v1385_v40 }
 0x188   : > { %1388 = vmatpush3.bf16.msra.mxu0 %v1385_v40 }
 0x189   : > { %1407 = vmatpush3.bf16.msra.mxu1 %v1385_v40  ;;  %1390 = vmatprep.subr.bf16.mxu0 %v1389_v54 }
 0x18a   : > { %1400 = vmatprep.subr.bf16.mxu1 %v1389_v54 }
 0x18c   : > { %1392 = vmatpush3.bf16.msra.mxu0 %v1389_v54 }
 0x18d   : > { %1408 = vmatpush3.bf16.msra.mxu1 %v1389_v54 }
 0x23b   : > { %v1299_v7 = vpop.f32.mrb[0].mxu0 }
 0x23c   : > { %v939_v8 = vadd.f32 %v1299_v7, %v1239_v53  ;;  %v933_v43 = vpop.f32.mrb[1].mxu0  ;;  %v1248_v7 = vld [vmem:[%s1944_s8] ss:$0 sm:$0xff] }
 0x23d   : > { %v934_v1 = vadd.f32 %v1239_v53, %v933_v43 }
 0x23e   : > { %v981_v11 = vmul.f32 0.70710677, %v939_v8  ;;  %v973_v22 = vmul.f32 0.5, %v939_v8 }
 0x23f   : > { %v980_v14 = vmul.f32 0.70710677, %v934_v1  ;;  %v972_v21 = vmul.f32 0.5, %v934_v1 }
 0x240   : > { %1440 = verf.f32 %v981_v11 }
 0x241   : > { %1442 = verf.f32 %v980_v14 }
 0x246   : > { %v1302_v2 = vpop.f32.mrb[2].mxu0 }
 0x247   : > { %v949_v3 = vadd.f32 %v1302_v2, %v1239_v53  ;;  %v943_v15 = vpop.f32.mrb[3].mxu0 }
 0x248   : > { %v944_v47 = vadd.f32 %v1239_v53, %v943_v15 }
 0x249   : > { %v983_v10 = vmul.f32 0.70710677, %v949_v3  ;;  %v975_v44 = vmul.f32 0.5, %v949_v3 }
 0x24a   : > { %v1441_v48 = vpop.eup %1440  ;;  %v982_v16 = vmul.f32 0.70710677, %v944_v47  ;;  %v974_v38 = vmul.f32 0.5, %v944_v47 }
 0x24b   : > { %v1443_v17 = vpop.eup %1442  ;;  %v997_v27 = vadd.f32 1.0, %v1441_v48  ;;  %1444 = verf.f32 %v983_v10 }
 0x24c   : > { %v996_v4 = vadd.f32 1.0, %v1443_v17  ;;  %1446 = verf.f32 %v982_v16 }
 0x24d   : > { %v1005_v23 = vmul.f32 %v997_v27, %v973_v22 }
 0x24e   : > { %v1004_v56 = vmul.f32 %v996_v4, %v972_v21 }
 0x250   : > { %1341 = vmatprep.mubr.f32.mxu0 %v1004_v56 }
 0x251   : > { %v1305_v31 = vpop.f32.mrb[4].mxu0  ;;  %1342 = vmatmul.mubr.f32.vlgmr.msra.gmra.mrb[8].mxu0 %v1005_v23 }
 0x252   : > { %v959_v49 = vadd.f32 %v1305_v31, %v1239_v53  ;;  %v953_v28 = vpop.f32.mrb[5].mxu0 }
 0x253   : > { %v954_v32 = vadd.f32 %v1239_v53, %v953_v28 }
 0x254   : > { %v985_v33 = vmul.f32 0.70710677, %v959_v49  ;;  %v977_v29 = vmul.f32 0.5, %v959_v49 }
 0x255   : > { %v1445_v19 = vpop.eup %1444  ;;  %v984_v61 = vmul.f32 0.70710677, %v954_v32  ;;  %v1308_v35 = vpop.f32.mrb[6].mxu0  ;;  %v976_v18 = vmul.f32 0.5, %v954_v32 }
 0x256   : > { %v1447_v34 = vpop.eup %1446  ;;  %v999_v30 = vadd.f32 1.0, %v1445_v19  ;;  %1448 = verf.f32 %v985_v33  ;;  %v969_v6 = vadd.f32 %v1308_v35, %v1239_v53  ;;  %v963_v24 = vpop.f32.mrb[7].mxu0 }
 0x257   : > { %1450 = verf.f32 %v984_v61  ;;  %v998_v36 = vadd.f32 1.0, %v1447_v34  ;;  %v964_v37 = vadd.f32 %v1239_v53, %v963_v24 }
 0x258   : > { %v987_v45 = vmul.f32 0.70710677, %v969_v6  ;;  %v1007_v51 = vmul.f32 %v999_v30, %v975_v44  ;;  %v979_v5 = vmul.f32 0.5, %v969_v6 }
 0x259   : > { %v1006_v46 = vmul.f32 %v998_v36, %v974_v38  ;;  %v986_v41 = vmul.f32 0.70710677, %v964_v37  ;;  %v978_v40 = vmul.f32 0.5, %v964_v37 }
 0x25a   : > { %1452 = verf.f32 %v987_v45 }
 0x25b   : > { %1344 = vmatprep.mubr.f32.mxu1 %v1006_v46  ;;  %1454 = verf.f32 %v986_v41 }
 0x25c   : > { %1345 = vmatmul.mubr.f32.vlgmr.msra.gmra.mrb[0].mxu1 %v1007_v51 }
 0x260   : > { %v1449_v63 = vpop.eup %1448 }
 0x261   : > { %v1451_v0 = vpop.eup %1450  ;;  %v1001_v52 = vadd.f32 1.0, %v1449_v63 }
 0x262   : > { %v1000_v55 = vadd.f32 1.0, %v1451_v0 }
 0x263   : > { %v1009_v59 = vmul.f32 %v1001_v52, %v977_v29 }
 0x264   : > { %v1008_v13 = vmul.f32 %v1000_v55, %v976_v18  ;;  %v1453_v57 = vpop.eup %1452 }
 0x265   : > { %v1455_v58 = vpop.eup %1454  ;;  %v1003_v60 = vadd.f32 1.0, %v1453_v57 }
 0x266   : > { %1347 = vmatprep.mubr.f32.mxu1 %v1008_v13  ;;  %v1002_v62 = vadd.f32 1.0, %v1455_v58 }
 0x267   : > { %1348 = vmatmul.mubr.f32.gmra.mrb[2].mxu1 %v1009_v59  ;;  %v1011_v53 = vmul.f32 %v1003_v60, %v979_v5 }
 0x268   : > { %v1010_v54 = vmul.f32 %v1002_v62, %v978_v40 }
 0x26a   : > { %1350 = vmatprep.mubr.f32.mxu1 %v1010_v54 }
 0x26b   : > { %1351 = vmatmul.mubr.f32.gmra.mrb[4].mxu1 %v1011_v53 }
 0x324   : > { %v1343_v8 = vpop.f32.mrb[8].mxu0 }
 0x325   : > { %v1107_v43 = vadd.f32 %v1343_v8, %v1248_v7  ;;  %v1101_v1 = vpop.f32.mrb[9].mxu0 }
 0x326   : > { %v1102_v11 = vadd.f32 %v1248_v7, %v1101_v1 }
 0x327   : > { %v1141_v14 = vadd.f32 %v1107_v43, %v1695_v12 }
 0x328   : > { %v1140_v2 = vadd.f32 %v1102_v11, %v1678_v50 }
 0x329   : > { %1149 = vst.msk [vmem:[%s337_s12 + $0x8] sm:$0xff] %vm392_vm0, %v1141_v14 }
 0x32a   : > { %1148 = vst.msk [vmem:[%s337_s12] sm:$0xff] %vm392_vm0, %v1140_v2 }
 0x32f   : > { %v1346_v3 = vpop.f32.mrb[0].mxu1 }
 0x330   : > { %v1117_v15 = vadd.f32 %v1346_v3, %v1248_v7  ;;  %v1111_v47 = vpop.f32.mrb[1].mxu1 }
 0x331   : > { %v1112_v10 = vadd.f32 %v1248_v7, %v1111_v47 }
 0x332   : > { %v1143_v48 = vadd.f32 %v1117_v15, %v1735_v9 }
 0x333   : > { %v1142_v16 = vadd.f32 %v1112_v10, %v1708_v25 }
 0x334   : > { %1151 = vst.msk [vmem:[%s337_s12 + $0x18] sm:$0xff] %vm392_vm0, %v1143_v48 }
 0x335   : > { %1150 = vst.msk [vmem:[%s337_s12 + $0x10] sm:$0xff] %vm392_vm0, %v1142_v16 }
 0x33a   : > { %v1349_v17 = vpop.f32.mrb[2].mxu1 }
 0x33b   : > { %v1127_v12 = vadd.f32 %v1349_v17, %v1248_v7  ;;  %v1121_v27 = vpop.f32.mrb[3].mxu1 }
 0x33c   : > { %v1122_v50 = vadd.f32 %v1248_v7, %v1121_v27 }
 0x33d   : > { %v1145_v21 = vadd.f32 %v1127_v12, %v1755_v39 }
 0x33e   : > { %v1144_v4 = vadd.f32 %v1122_v50, %v1721_v26  ;;  %v1352_v22 = vpop.f32.mrb[4].mxu1 }
 0x33f   : > { %1153 = vst.msk [vmem:[%s337_s12 + $0x28] sm:$0xff] %vm392_vm0, %v1145_v21  ;;  %v1137_v9 = vadd.f32 %v1352_v22, %v1248_v7  ;;  %v1131_v56 = vpop.f32.mrb[5].mxu1 }
 0x340   : > { %1152 = vst.msk [vmem:[%s337_s12 + $0x20] sm:$0xff] %vm392_vm0, %v1144_v4  ;;  %v1132_v25 = vadd.f32 %v1248_v7, %v1131_v56 }
 0x341   : > { %v1147_v23 = vadd.f32 %v1137_v9, %v1760_v42 }
 0x342   : > { %v1146_v31 = vadd.f32 %v1132_v25, %v1746_v20 }
 0x343   : > { %1155 = vst.msk [vmem:[%s337_s12 + $0x38] sm:$0xff] %vm392_vm0, %v1147_v23 }
 0x344   : > { %1154 = vst.msk [vmem:[%s337_s12 + $0x30] sm:$0xff] %vm392_vm0, %v1146_v31 }
 0x345 PF: > { %s19_s30 = sadd.s32 1, %s1462_s30  }
 0x346   : > { %p16_p5 = scmp.ge.s32.totalorder %s19_s30, 4  }
 0x348   :  { %18 = sbr.rel (!%p16_p5) target bundleno = 1 (0x1), region = 93 }

// kernel: tiny_vit_block_forward.2
= control target key start
LH: loop header
LB: loop body
LE: loop exit
PB: predicated region body
PF: predicated region fallthrough
CT: control target
= control target key end

     0   :  { %s3105_s27 = smov 0   ;;  %s3539_s0 = inlined_call_operand.vmem [shape: f32[128,32], index: 0, kind: input, shape index: {}]   ;;  %s3540_s1 = inlined_call_operand.vmem [shape: f32[1,32], index: 1, kind: input, shape index: {}]   ;;  %s3541_s2 = inlined_call_operand.vmem [shape: f32[1,32], index: 2, kind: input, shape index: {}]   ;;  %s3542_s3 = inlined_call_operand.vmem [shape: f32[32,96], index: 3, kind: input, shape index: {}]   ;;  %s3543_s4 = inlined_call_operand.vmem [shape: f32[1,96], index: 4, kind: input, shape index: {}]   ;;  %s3544_s5 = inlined_call_operand.vmem [shape: f32[32,32], index: 5, kind: input, shape index: {}]   ;;  %s3545_s6 = inlined_call_operand.vmem [shape: f32[1,32], index: 6, kind: input, shape index: {}]   ;;  %s3546_s7 = inlined_call_operand.vmem [shape: f32[2,16,16], index: 7, kind: input, shape index: {}]   ;;  %s3547_s8 = inlined_call_operand.vmem [shape: f32[128,32], index: 8, kind: output, shape index: {}]  }
   0x1 LB: > { %s2443_s28 = sadd.s32 4294967295, %s3052_s27   ;;  %p2447_p0 = scmp.ge.s32.totalorder %s3052_s27, 1  ;;  %s3052_s27 = sphi %s3105_s27, %s18_s27  }
   0x2   : > { %p263_p1 = scmp.lt.s32.totalorder %s3052_s27, 3 }
   0x4   : > { %p264_p2 = pnand %p2447_p0, %p263_p1 }
   0x5   : > { %s2448_s29 = sshll.u32 (!%p264_p2), %s2443_s28, 3  ;;  %vm319_vm0 = vcmask (!%p264_p2), 261120   ;;  %v453_v56 = vld [vmem:[%s3542_s3] sm:$0xff] (!%p264_p2)  ;;  %v454_v57 = vld [vmem:[%s3542_s3 + $0x8] sm:$0xff] (!%p264_p2)  ;;  %v455_v59 = vld [vmem:[%s3542_s3 + $0x10] sm:$0xff] (!%p264_p2)  ;;  %vm601_vm1 = vcmask (!%p264_p2), 130048  }
   0x6   : > { %267 = sbr.rel (%p264_p2) target bundleno = 2386 (0x952), region = 52  ;;  %p298_p3 = scmp.lt.s32.totalorder (!%p264_p2), %s2448_s29, 15  ;;  %v2764_v58 = vpack.c.bf16 (!%p264_p2), %v454_v57, %v453_v56  ;;  %v456_v60 = vld [vmem:[%s3542_s3 + $0x18] sm:$0xff] (!%p264_p2)  ;;  %vm3262_vm2 = vmpackc.low (!%p264_p2), %vm601_vm1, %vm601_vm1 }
   0x7   : > { %v2768_v61 = vpack.c.bf16 (!%p264_p2), %v456_v60, %v455_v59  ;;  %s3054_s26 = smov (!%p264_p2), 96   ;;  %s3055_s28 = smov (!%p264_p2), 64  }
   0x8   : > { %2765 = vmatprep.subr.bf16.mxu0 (!%p264_p2), %v2764_v58  ;;  %2860 = vmatprep.subr.bf16.mxu1 (!%p264_p2), %v2764_v58  ;;  %s3056_s14 = smov (!%p264_p2), 80   ;;  %s3057_s15 = smov (!%p264_p2), 112  }
   0x9   : > { %2767 = vmatpush3.bf16.msra.mxu0 (!%p264_p2), %v2764_v58  ;;  %2862 = vmatpush3.bf16.msra.mxu1 (!%p264_p2), %v2764_v58  ;;  %s3058_s20 = smov (!%p264_p2), 48   ;;  %s3059_s10 = smov (!%p264_p2), 16  }
   0xa   : > { %2769 = vmatprep.subr.bf16.mxu0 (!%p264_p2), %v2768_v61  ;;  %2861 = vmatprep.subr.bf16.mxu1 (!%p264_p2), %v2768_v61 }
   0xd   : > { %s3551_s29 = smov (!%p298_p3, %s2448_s29), 15  ;;  %2771 = vmatpush3.bf16.msra.mxu0 %v2768_v61  ;;  %2863 = vmatpush3.bf16.msra.mxu1 %v2768_v61 }
   0xe   : > { %s2449_s30 = sshll.u32 %s3551_s29, 3 }
   0xf   : > { %s3121_s11 = scalar_lea.vmem %s3539_s0, %s2449_s30  ;;  %s3510_s16 = scalar_lea.vmem %s3547_s8, %s2449_s30 }
  0x10   : > { %v309_v0 = vld [vmem:[%s3121_s11] sm:$0xff]  ;;  %v311_v1 = vld [vmem:[%s3121_s11 + $0x10] sm:$0xff]  ;;  %v310_v2 = vld [vmem:[%s3121_s11 + $0x8] sm:$0xff] }
  0x11   : > { %v320_v3 = vsel %vm319_vm0, %v309_v0, 0.0  ;;  %v326_v4 = vsel %vm319_vm0, %v311_v1, 0.0  ;;  %v312_v5 = vld [vmem:[%s3121_s11 + $0x18] sm:$0xff]  ;;  %v323_v6 = vsel %vm319_vm0, %v310_v2, 0.0  ;;  %v313_v8 = vld [vmem:[%s3121_s11 + $0x20] sm:$0xff]  ;;  %v314_v9 = vld [vmem:[%s3121_s11 + $0x28] sm:$0xff] }
  0x12   : > { %321 = vadd.xlane.f32.xlu0 %v320_v3  ;;  %327 = vadd.xlane.f32.xlu1 %v326_v4  ;;  %v329_v7 = vsel %vm319_vm0, %v312_v5, 0.0  ;;  %v332_v10 = vsel %vm319_vm0, %v313_v8, 0.0  ;;  %v335_v11 = vsel %vm319_vm0, %v314_v9, 0.0  ;;  %v315_v12 = vld [vmem:[%s3121_s11 + $0x30] sm:$0xff]  ;;  %v316_v13 = vld [vmem:[%s3121_s11 + $0x38] sm:$0xff] }
  0x13   : > { %v338_v14 = vsel %vm319_vm0, %v315_v12, 0.0  ;;  %v341_v15 = vsel %vm319_vm0, %v316_v13, 0.0 }
  0x16   : > { %324 = vadd.xlane.f32.xlu0 %v323_v6  ;;  %330 = vadd.xlane.f32.xlu1 %v329_v7 }
  0x1a   : > { %333 = vadd.xlane.f32.xlu0 %v332_v10  ;;  %336 = vadd.xlane.f32.xlu1 %v335_v11 }
  0x1e   : > { %339 = vadd.xlane.f32.xlu0 %v338_v14  ;;  %342 = vadd.xlane.f32.xlu1 %v341_v15 }
  0x9f   : > { %v322_v16 = vpop.xlane.xlu0 %321  ;;  %v328_v17 = vpop.xlane.xlu1 %327 }
  0xa0   : > { %v345_v18 = vmul.f32 0.03125, %v322_v16  ;;  %v347_v19 = vmul.f32 0.03125, %v328_v17 }
  0xa2   : > { %v3139_v20 = vsub.f32 %v309_v0, %v345_v18  ;;  %v3141_v21 = vsub.f32 %v311_v1, %v347_v19 }
  0xa3   : > { %v325_v22 = vpop.xlane.xlu0 %324  ;;  %v331_v23 = vpop.xlane.xlu1 %330 }
  0xa4   : > { %v346_v24 = vmul.f32 0.03125, %v325_v22  ;;  %v348_v25 = vmul.f32 0.03125, %v331_v23  ;;  %v361_v26 = vmul.f32 %v3139_v20, %v3139_v20  ;;  %v363_v27 = vmul.f32 %v3141_v21, %v3141_v21  ;;  %v2452_v22 = vld [vmem:[%s3540_s1] ss:$0 sm:$0xff] }
  0xa6   : > { %v3147_v28 = vsub.f32 %v310_v2, %v346_v24  ;;  %v3149_v29 = vsub.f32 %v312_v5, %v348_v25  ;;  %v369_v30 = vsel %vm319_vm0, %v361_v26, 0.0  ;;  %v375_v33 = vsel %vm319_vm0, %v363_v27, 0.0  ;;  %v2453_v26 = vld [vmem:[%s3541_s2] ss:$0 sm:$0xff] }
  0xa7   : > { %370 = vadd.xlane.f32.xlu0 %v369_v30  ;;  %v334_v31 = vpop.xlane.xlu0 %333  ;;  %v337_v32 = vpop.xlane.xlu1 %336 }
  0xa8   : > { %v349_v34 = vmul.f32 0.03125, %v334_v31  ;;  %v350_v35 = vmul.f32 0.03125, %v337_v32  ;;  %v362_v36 = vmul.f32 %v3147_v28, %v3147_v28  ;;  %v364_v37 = vmul.f32 %v3149_v29, %v3149_v29 }
  0xaa   : > { %v3157_v38 = vsub.f32 %v313_v8, %v349_v34  ;;  %v3159_v39 = vsub.f32 %v314_v9, %v350_v35  ;;  %v372_v40 = vsel %vm319_vm0, %v362_v36, 0.0  ;;  %v378_v43 = vsel %vm319_vm0, %v364_v37, 0.0 }
  0xab   : > { %376 = vadd.xlane.f32.xlu0 %v375_v33  ;;  %373 = vadd.xlane.f32.xlu1 %v372_v40  ;;  %v340_v41 = vpop.xlane.xlu0 %339  ;;  %v343_v42 = vpop.xlane.xlu1 %342 }
  0xac   : > { %v351_v44 = vmul.f32 0.03125, %v340_v41  ;;  %v352_v45 = vmul.f32 0.03125, %v343_v42  ;;  %v365_v46 = vmul.f32 %v3157_v38, %v3157_v38  ;;  %v366_v47 = vmul.f32 %v3159_v39, %v3159_v39 }
  0xae   : > { %v3167_v48 = vsub.f32 %v315_v12, %v351_v44  ;;  %v3169_v49 = vsub.f32 %v316_v13, %v352_v45  ;;  %v381_v50 = vsel %vm319_vm0, %v365_v46, 0.0  ;;  %v384_v51 = vsel %vm319_vm0, %v366_v47, 0.0 }
  0xaf   : > { %379 = vadd.xlane.f32.xlu1 %v378_v43  ;;  %382 = vadd.xlane.f32.xlu0 %v381_v50 }
  0xb0   : > { %v367_v52 = vmul.f32 %v3167_v48, %v3167_v48  ;;  %v368_v53 = vmul.f32 %v3169_v49, %v3169_v49 }
  0xb2   : > { %v387_v54 = vsel %vm319_vm0, %v367_v52, 0.0  ;;  %v390_v55 = vsel %vm319_vm0, %v368_v53, 0.0 }
  0xb3   : > { %385 = vadd.xlane.f32.xlu1 %v384_v51  ;;  %388 = vadd.xlane.f32.xlu0 %v387_v54 }
  0xb7   : > { %391 = vadd.xlane.f32.xlu1 %v390_v55 }
 0x134   : > { %v371_v62 = vpop.xlane.xlu0 %370 }
 0x135   : > { %v393_v63 = vmul.f32 0.03125, %v371_v62 }
 0x137   : > { %v401_v0 = vadd.f32 1e-05, %v393_v63 }
 0x138   : > { %v374_v1 = vpop.xlane.xlu1 %373  ;;  %v377_v2 = vpop.xlane.xlu0 %376 }
 0x139   : > { %2958 = vrsqrt.f32 %v401_v0  ;;  %v394_v3 = vmul.f32 0.03125, %v374_v1  ;;  %v395_v4 = vmul.f32 0.03125, %v377_v2 }
 0x13b   : > { %v402_v5 = vadd.f32 1e-05, %v394_v3  ;;  %v403_v6 = vadd.f32 1e-05, %v395_v4 }
 0x13c   : > { %v380_v7 = vpop.xlane.xlu1 %379  ;;  %v383_v8 = vpop.xlane.xlu0 %382 }
 0x13d   : > { %2960 = vrsqrt.f32 %v402_v5  ;;  %v396_v9 = vmul.f32 0.03125, %v380_v7  ;;  %v397_v10 = vmul.f32 0.03125, %v383_v8 }
 0x13e   : > { %2962 = vrsqrt.f32 %v403_v6 }
 0x13f   : > { %v404_v11 = vadd.f32 1e-05, %v396_v9  ;;  %v405_v12 = vadd.f32 1e-05, %v397_v10 }
 0x140   : > { %v386_v13 = vpop.xlane.xlu1 %385  ;;  %v389_v14 = vpop.xlane.xlu0 %388 }
 0x141   : > { %2964 = vrsqrt.f32 %v404_v11  ;;  %v398_v15 = vmul.f32 0.03125, %v386_v13  ;;  %v399_v16 = vmul.f32 0.03125, %v389_v14 }
 0x142   : > { %2966 = vrsqrt.f32 %v405_v12 }
 0x143   : > { %v2959_v17 = vpop.eup %2958  ;;  %v406_v18 = vadd.f32 1e-05, %v398_v15  ;;  %v407_v19 = vadd.f32 1e-05, %v399_v16  ;;  %v2488_v16 = vld [vmem:[%s3546_s7 + $0x18] sm:$0xff] }
 0x144   : > { %v392_v23 = vpop.xlane.xlu1 %391  ;;  %v417_v24 = vmul.f32 %v2959_v17, %v3139_v20 }
 0x145   : > { %2968 = vrsqrt.f32 %v406_v18  ;;  %v400_v25 = vmul.f32 0.03125, %v392_v23 }
 0x146   : > { %2970 = vrsqrt.f32 %v407_v19  ;;  %v431_v27 = vmul.f32 %v2452_v22, %v417_v24 }
 0x147   : > { %v2961_v30 = vpop.eup %2960  ;;  %v408_v31 = vadd.f32 1e-05, %v400_v25 }
 0x148   : > { %v2963_v32 = vpop.eup %2962  ;;  %v445_v33 = vadd.f32 %v2453_v26, %v431_v27  ;;  %v418_v34 = vmul.f32 %v2961_v30, %v3147_v28 }
 0x149   : > { %2972 = vrsqrt.f32 %v408_v31  ;;  %v419_v35 = vmul.f32 %v2963_v32, %v3141_v21 }
 0x14a   : > { %2620 = vmatprep.mubr.msk.f32.mxu0 %vm319_vm0, %v445_v33  ;;  %v432_v20 = vmul.f32 %v2452_v22, %v418_v34 }
 0x14b   : > { %v2965_v36 = vpop.eup %2964  ;;  %v433_v37 = vmul.f32 %v2452_v22, %v419_v35 }
 0x14c   : > { %v2967_v40 = vpop.eup %2966  ;;  %v446_v41 = vadd.f32 %v2453_v26, %v432_v20  ;;  %v420_v42 = vmul.f32 %v2965_v36, %v3149_v29 }
 0x14d   : > { %v447_v43 = vadd.f32 %v2453_v26, %v433_v37  ;;  %v421_v44 = vmul.f32 %v2967_v40, %v3157_v38 }
 0x14e   : > { %2621 = vmatmul.mubr.msk.f32.vlgmr.msra.gmra.mrb[0].mxu0 %vm319_vm0, %v446_v41  ;;  %v434_v45 = vmul.f32 %v2452_v22, %v420_v42 }
 0x14f   : > { %v2969_v46 = vpop.eup %2968  ;;  %2623 = vmatprep.mubr.msk.f32.mxu0 %vm319_vm0, %v447_v43  ;;  %v435_v28 = vmul.f32 %v2452_v22, %v421_v44 }
 0x150   : > { %v2971_v21 = vpop.eup %2970  ;;  %v448_v47 = vadd.f32 %v2453_v26, %v434_v45  ;;  %v422_v50 = vmul.f32 %v2969_v46, %v3159_v39 }
 0x151   : > { %v449_v51 = vadd.f32 %v2453_v26, %v435_v28  ;;  %v423_v52 = vmul.f32 %v2971_v21, %v3167_v48  ;;  %v2454_v48 = vld [vmem:[%s3543_s4] ss:$0 sm:$0xff] }
 0x152   : > { %2624 = vmatmul.mubr.msk.f32.gmra.mrb[2].mxu0 %vm319_vm0, %v448_v47  ;;  %v436_v29 = vmul.f32 %v2452_v22, %v422_v50 }
 0x153   : > { %v2973_v53 = vpop.eup %2972  ;;  %2626 = vmatprep.mubr.msk.f32.mxu1 %vm319_vm0, %v449_v51  ;;  %v437_v38 = vmul.f32 %v2452_v22, %v423_v52  ;;  %v594_v51 = vld [vmem:[%s3546_s7 + $0x8] sm:$0xff]  ;;  %v593_v52 = vld [vmem:[%s3546_s7] sm:$0xff] }
 0x154   : > { %v450_v54 = vadd.f32 %v2453_v26, %v436_v29  ;;  %v424_v55 = vmul.f32 %v2973_v53, %v3169_v49 }
 0x155   : > { %v451_v56 = vadd.f32 %v2453_v26, %v437_v38 }
 0x156   : > { %2627 = vmatmul.mubr.msk.f32.vlgmr.msra.gmra.mrb[0].mxu1 %vm319_vm0, %v450_v54  ;;  %v438_v57 = vmul.f32 %v2452_v22, %v424_v55 }
 0x157   : > { %2629 = vmatprep.mubr.msk.f32.mxu1 %vm319_vm0, %v451_v56 }
 0x158   : > { %v452_v39 = vadd.f32 %v2453_v26, %v438_v57 }
 0x15a   : > { %2630 = vmatmul.mubr.msk.f32.gmra.mrb[2].mxu1 %vm319_vm0, %v452_v39 }
 0x221   : > { %v2622_v58 = vpop.f32.mrb[0].mxu0 }
 0x222   : > { %v3216_v59 = vadd.f32 %v2622_v58, %v2454_v48  ;;  %v554_v60 = vpop.f32.mrb[1].mxu0 }
 0x223   : > { %v3218_v61 = vadd.f32 %v2454_v48, %v554_v60 }
 0x225   : > { %v2625_v49 = vpop.f32.mrb[2].mxu0  ;;  %2636 = vmatprep.mubr.msk.f32.mxu1 %vm601_vm1, %v3218_v61  ;;  %v3224_v62 = vpack.i.bf16 %v3216_v59, %v3218_v61 }
 0x226   : > { %v3226_v63 = vadd.f32 %v2625_v49, %v2454_v48  ;;  %v564_v0 = vpop.f32.mrb[3].mxu0 }
 0x227   : > { %v3228_v1 = vadd.f32 %v2454_v48, %v564_v0  ;;  %2879 = vrot.lane.b32.xlu0 %v3224_v62, %s3054_s26 }
 0x229   : > { %v2628_v2 = vpop.f32.mrb[0].mxu1  ;;  %v3233_v3 = vpack.i.bf16 %v3226_v63, %v3228_v1 }
 0x22a   : > { %v3235_v4 = vadd.f32 %v2628_v2, %v2454_v48  ;;  %v574_v5 = vpop.f32.mrb[1].mxu1 }
 0x22b   : > { %v3237_v6 = vadd.f32 %v2454_v48, %v574_v5  ;;  %2899 = vrot.lane.b32.xlu0 %v3224_v62, %s3055_s28  ;;  %2884 = vrot.lane.b32.xlu1 %v3233_v3, %s3054_s26 }
 0x22d   : > { %v2631_v7 = vpop.f32.mrb[2].mxu1  ;;  %2650 = vmatprep.mubr.msk.f32.mxu0 %vm601_vm1, %v3237_v6  ;;  %v3245_v8 = vpack.i.bf16 %v3235_v4, %v3237_v6 }
 0x22e   : > { %v3247_v9 = vadd.f32 %v2631_v7, %v2454_v48  ;;  %v584_v10 = vpop.f32.mrb[3].mxu1 }
 0x22f   : > { %v3249_v11 = vadd.f32 %v2454_v48, %v584_v10  ;;  %2889 = vrot.lane.b32.xlu1 %v3245_v8, %s3054_s26 }
 0x231   : > { %v3254_v12 = vpack.i.bf16 %v3247_v9, %v3249_v11 }
 0x233   : > { %2894 = vrot.lane.b32.xlu1 %v3254_v12, %s3054_s26 }
 0x237   : > { %2904 = vrot.lane.b32.xlu1 %v3245_v8, %s3055_s28 }
 0x23b   : > { %2909 = vrot.lane.b32.xlu1 %v3233_v3, %s3055_s28 }
 0x23f   : > { %2914 = vrot.lane.b32.xlu1 %v3254_v12, %s3055_s28 }
 0x299   : > { %v2880_v13 = vpop.permute.xlu0 %2879 }
 0x29a   : > { %v2882_v14 = vunpack.i.h.bf16 %v2880_v13  ;;  %v2881_v15 = vunpack.i.l.bf16 %v2880_v13 }
 0x29c   : > { %v2772_v17 = vpack.c.bf16 %v2882_v14, %v2881_v15 }
 0x29d   : > { %v2885_v18 = vpop.permute.xlu1 %2884  ;;  %v2900_v24 = vpop.permute.xlu0 %2899 }
 0x29e   : > { %v2887_v19 = vunpack.i.h.bf16 %v2885_v18  ;;  %v2886_v22 = vunpack.i.l.bf16 %v2885_v18  ;;  %2774 = vmatprep.subr.msk.bf16.mxu1 %vm3262_vm2, %v2772_v17  ;;  %v2902_v30 = vunpack.i.h.bf16 %v2900_v24  ;;  %v2901_v31 = vunpack.i.l.bf16 %v2900_v24 }
 0x29f   : > { %2777 = vmatpush3.bf16.xpose.msk.msra.mxu1 %vm3262_vm2, %v2772_v17 }
 0x2a0   : > { %v2778_v23 = vpack.c.bf16 %v2887_v19, %v2886_v22  ;;  %v2796_v20 = vpack.c.bf16 %v2902_v30, %v2901_v31 }
 0x2a1   : > { %v2890_v25 = vpop.permute.xlu1 %2889 }
 0x2a2   : > { %v2892_v26 = vunpack.i.h.bf16 %v2890_v25  ;;  %v2891_v27 = vunpack.i.l.bf16 %v2890_v25  ;;  %2780 = vmatprep.subr.msk.bf16.mxu1 %vm3262_vm2, %v2778_v23 }
 0x2a4   : > { %v2784_v32 = vpack.c.bf16 %v2892_v26, %v2891_v27 }
 0x2a5   : > { %v2895_v33 = vpop.permute.xlu1 %2894 }
 0x2a6   : > { %v2897_v34 = vunpack.i.h.bf16 %v2895_v33  ;;  %v2896_v35 = vunpack.i.l.bf16 %v2895_v33  ;;  %2637 = vmatmul.mubr.msk.f32.vlgmr.msra.gmra.mrb[4].mxu1 %vm601_vm1, %v3216_v59  ;;  %2786 = vmatprep.subr.msk.bf16.mxu0 %vm3262_vm2, %v2784_v32 }
 0x2a7   : > { %2783 = vmatpush3.bf16.xpose.msk.msra.mxu1 %vm3262_vm2, %v2778_v23  ;;  %2643 = vmatprep.mubr.msk.f32.mxu1 %vm601_vm1, %v3228_v1 }
 0x2a8   : > { %v2790_v36 = vpack.c.bf16 %v2897_v34, %v2896_v35  ;;  %2789 = vmatpush3.bf16.xpose.msk.msra.mxu0 %vm3262_vm2, %v2784_v32 }
 0x2a9   : > { %2797 = vmatprep.subr.bf16.mxu0 %v2796_v20  ;;  %v2905_v37 = vpop.permute.xlu1 %2904 }
 0x2aa   : > { %2792 = vmatprep.subr.msk.bf16.mxu1 %vm3262_vm2, %v2790_v36  ;;  %v2907_v40 = vunpack.i.h.bf16 %v2905_v37  ;;  %v2906_v41 = vunpack.i.l.bf16 %v2905_v37 }
 0x2ac   : > { %v3286_v45 = vpack.c.bf16 %v2907_v40, %v2906_v41 }
 0x2ad   : > { %v2910_v42 = vpop.permute.xlu1 %2909 }
 0x2ae   : > { %v2912_v43 = vunpack.i.h.bf16 %v2910_v42  ;;  %v2911_v44 = vunpack.i.l.bf16 %v2910_v42  ;;  %2644 = vmatmul.mubr.msk.f32.vlgmr.msra.gmra.mrb[6].mxu1 %vm601_vm1, %v3226_v63 }
 0x2af   : > { %2651 = vmatmul.mubr.msk.f32.vlgmr.msra.gmra.mrb[4].mxu0 %vm601_vm1, %v3235_v4  ;;  %2795 = vmatpush3.bf16.xpose.msk.msra.mxu1 %vm3262_vm2, %v2790_v36 }
 0x2b0   : > { %v2800_v46 = vpack.c.bf16 %v2912_v43, %v2911_v44  ;;  %2657 = vmatprep.mubr.msk.f32.mxu1 %vm601_vm1, %v3249_v11  ;;  %2799 = vmatpush3.bf16.msra.mxu0 %v2796_v20 }
 0x2b1   : > { %2805 = vmatprep.subr.bf16.mxu0 %v3286_v45  ;;  %v2915_v28 = vpop.permute.xlu1 %2914 }
 0x2b2   : > { %v2917_v21 = vunpack.i.h.bf16 %v2915_v28  ;;  %v2916_v47 = vunpack.i.l.bf16 %v2915_v28  ;;  %2801 = vmatprep.subr.bf16.mxu1 %v2800_v46 }
 0x2b4   : > { %v3295_v50 = vpack.c.bf16 %v2917_v21, %v2916_v47 }
 0x2b6   : > { %2658 = vmatmul.mubr.msk.f32.vlgmr.msra.gmra.mrb[8].mxu1 %vm601_vm1, %v3247_v9 }
 0x2b7   : > { %2803 = vmatpush3.bf16.msra.mxu1 %v2800_v46 }
 0x2b8   : > { %2809 = vmatprep.subr.bf16.mxu1 %v3295_v50 }
 0x379   : > { %v2638_v29 = vpop.f32.mrb[4].mxu1 }
 0x37a   : > { %v682_v53 = vadd.f32 %v2638_v29, %v594_v51  ;;  %v676_v38 = vpop.f32.mrb[5].mxu1 }
 0x37b   : > { %v677_v54 = vadd.f32 %v676_v38, %v593_v52 }
 0x37c   : > { %v955_v55 = vsel %vm601_vm1, %v682_v53, -inf }
 0x37d   : > { %956 = vmax.xlane.f32.xlu1 %v955_v55  ;;  %v952_v56 = vsel %vm601_vm1, %v677_v54, -inf }
 0x37e   : > { %953 = vmax.xlane.f32.xlu0 %v952_v56 }
 0x381   : > { %v2645_v57 = vpop.f32.mrb[6].mxu1 }
 0x382   : > { %v2652_v39 = vpop.f32.mrb[4].mxu0  ;;  %v765_v48 = vpop.f32.mrb[7].mxu1  ;;  %v771_v2 = vadd.f32 %v2645_v57, %v594_v51 }
 0x383   : > { %v860_v58 = vadd.f32 %v2652_v39, %v594_v51  ;;  %v854_v60 = vpop.f32.mrb[5].mxu0  ;;  %v766_v10 = vadd.f32 %v765_v48, %v593_v52 }
 0x384   : > { %v855_v49 = vadd.f32 %v854_v60, %v593_v52  ;;  %v961_v15 = vsel %vm601_vm1, %v771_v2, -inf }
 0x385   : > { %v967_v0 = vsel %vm601_vm1, %v860_v58, -inf  ;;  %v958_v19 = vsel %vm601_vm1, %v766_v10, -inf }
 0x386   : > { %968 = vmax.xlane.f32.xlu1 %v967_v0  ;;  %v964_v5 = vsel %vm601_vm1, %v855_v49, -inf }
 0x387   : > { %965 = vmax.xlane.f32.xlu0 %v964_v5 }
 0x389   : > { %v2659_v7 = vpop.f32.mrb[8].mxu1 }
 0x38a   : > { %v949_v13 = vadd.f32 %v2659_v7, %v594_v51  ;;  %v943_v14 = vpop.f32.mrb[9].mxu1 }
 0x38b   : > { %962 = vmax.xlane.f32.xlu0 %v961_v15  ;;  %v944_v18 = vadd.f32 %v943_v14, %v593_v52 }
 0x38c   : > { %v973_v17 = vsel %vm601_vm1, %v949_v13, -inf }
 0x38d   : > { %974 = vmax.xlane.f32.xlu1 %v973_v17  ;;  %v970_v22 = vsel %vm601_vm1, %v944_v18, -inf }
 0x38f   : > { %959 = vmax.xlane.f32.xlu0 %v958_v19 }
 0x393   : > { %971 = vmax.xlane.f32.xlu0 %v970_v22 }
 0x39e   : > { %2924 = vrot.lane.b32.xlu1 %v3233_v3, %s3056_s14 }
 0x3a9   : > { %2919 = vrot.lane.b32.xlu0 %v3224_v62, %s3056_s14 }
 0x40a   : > { %v957_v23 = vpop.xlane.xlu1 %956 }
 0x40b   : > { %v977_v24 = vsub.f32 %v682_v53, %v957_v23  ;;  %v954_v25 = vpop.xlane.xlu0 %953 }
 0x40c   : > { %v976_v26 = vsub.f32 %v677_v54, %v954_v25 }
 0x40d   : > { %v986_v27 = vmul.f32 1.442695, %v977_v24 }
 0x40e   : > { %v984_v30 = vmul.f32 1.442695, %v976_v26 }
 0x40f   : > { %2974 = vpow2.f32 %v986_v27 }
 0x410   : > { %2976 = vpow2.f32 %v984_v30 }
 0x413   : > { %v969_v31 = vpop.xlane.xlu1 %968 }
 0x414   : > { %v981_v32 = vsub.f32 %v860_v58, %v969_v31  ;;  %v966_v33 = vpop.xlane.xlu0 %965 }
 0x415   : > { %v980_v34 = vsub.f32 %v855_v49, %v966_v33 }
 0x416   : > { %v994_v35 = vmul.f32 1.442695, %v981_v32 }
 0x417   : > { %v992_v20 = vmul.f32 1.442695, %v980_v34 }
 0x418   : > { %2978 = vpow2.f32 %v994_v35  ;;  %v963_v36 = vpop.xlane.xlu0 %962 }
 0x419   : > { %v3318_v37 = vpop.eup %2974  ;;  %2980 = vpow2.f32 %v992_v20  ;;  %v979_v40 = vsub.f32 %v771_v2, %v963_v36 }
 0x41a   : > { %v2977_v41 = vpop.eup %2976  ;;  %v1003_v42 = vsel %vm601_vm1, %v3318_v37, 0.0  ;;  %v975_v56 = vpop.xlane.xlu1 %974 }
 0x41b   : > { %v990_v43 = vmul.f32 1.442695, %v979_v40  ;;  %1004 = vadd.xlane.f32.xlu1 %v1003_v42  ;;  %v1000_v44 = vsel %vm601_vm1, %v2977_v41, 0.0  ;;  %v983_v57 = vsub.f32 %v949_v13, %v975_v56 }
 0x41c   : > { %v960_v46 = vpop.xlane.xlu0 %959  ;;  %1001 = vadd.xlane.f32.xlu0 %v1000_v44 }
 0x41d   : > { %2982 = vpow2.f32 %v990_v43  ;;  %v978_v28 = vsub.f32 %v766_v10, %v960_v46  ;;  %v998_v48 = vmul.f32 1.442695, %v983_v57 }
 0x41e   : > { %v2925_v5 = vpop.permute.xlu1 %2924 }
 0x41f   : > { %v988_v21 = vmul.f32 1.442695, %v978_v28  ;;  %v2927_v33 = vunpack.i.h.bf16 %v2925_v5  ;;  %v2926_v34 = vunpack.i.l.bf16 %v2925_v5 }
 0x420   : > { %v972_v39 = vpop.xlane.xlu0 %971 }
 0x421   : > { %2984 = vpow2.f32 %v988_v21  ;;  %v982_v58 = vsub.f32 %v944_v18, %v972_v39  ;;  %v2818_v36 = vpack.c.bf16 %v2927_v33, %v2926_v34 }
 0x422   : > { %v3323_v47 = vpop.eup %2978  ;;  %2986 = vpow2.f32 %v998_v48 }
 0x423   : > { %v3325_v51 = vpop.eup %2980  ;;  %v1015_v52 = vsel %vm601_vm1, %v3323_v47, 0.0  ;;  %v996_v60 = vmul.f32 1.442695, %v982_v58 }
 0x424   : > { %1016 = vadd.xlane.f32.xlu1 %v1015_v52  ;;  %v1012_v29 = vsel %vm601_vm1, %v3325_v51, 0.0  ;;  %v2920_v7 = vpop.permute.xlu0 %2919 }
 0x425   : > { %1013 = vadd.xlane.f32.xlu0 %v1012_v29  ;;  %2988 = vpow2.f32 %v996_v60  ;;  %v2922_v15 = vunpack.i.h.bf16 %v2920_v7  ;;  %v2487_v60 = vld [vmem:[%s3546_s7 + $0x10] sm:$0xff] }
 0x427   : > { %v3331_v53 = vpop.eup %2982 }
 0x428   : > { %v1009_v38 = vsel %vm601_vm1, %v3331_v53, 0.0 }
 0x429   : > { %1010 = vadd.xlane.f32.xlu1 %v1009_v38 }
 0x42b   : > { %v3335_v54 = vpop.eup %2984 }
 0x42c   : > { %v1006_v55 = vsel %vm601_vm1, %v3335_v54, 0.0  ;;  %v3342_v49 = vpop.eup %2986 }
 0x42d   : > { %1007 = vadd.xlane.f32.xlu0 %v1006_v55  ;;  %v1021_v0 = vsel %vm601_vm1, %v3342_v49, 0.0 }
 0x42f   : > { %v3346_v2 = vpop.eup %2988 }
 0x43a   : > { %1391 = vrot.lane.b32.xlu1 %v3218_v61, %s3057_s15  ;;  %v1018_v61 = vsel %vm601_vm1, %v3346_v2, 0.0 }
 0x443   : > { %2929 = vrot.lane.b32.xlu0 %v3245_v8, %s3056_s14 }
 0x45e   : > { %1022 = vadd.xlane.f32.xlu1 %v1021_v0 }
 0x462   : > { %1019 = vadd.xlane.f32.xlu0 %v1018_v61 }
 0x46f   : > { %2934 = vrot.lane.b32.xlu1 %v3254_v12, %s3056_s14 }
 0x473   : > { %1484 = vrot.lane.b32.xlu1 %v3226_v63, %s3057_s15 }
 0x477   : > { %1575 = vrot.lane.b32.xlu1 %v3235_v4, %s3057_s15 }
 0x478   : > { %1393 = vrot.lane.b32.xlu0 %v3216_v59, %s3057_s15 }
 0x47b   : > { %1666 = vrot.lane.b32.xlu1 %v3247_v9, %s3057_s15  ;;  %v2921_v9 = vunpack.i.l.bf16 %v2920_v7 }
 0x47c   : > { %1482 = vrot.lane.b32.xlu0 %v3228_v1, %s3057_s15 }
 0x480   : > { %1573 = vrot.lane.b32.xlu0 %v3237_v6, %s3057_s15 }
 0x484   : > { %1664 = vrot.lane.b32.xlu0 %v3249_v11, %s3057_s15  ;;  %v2812_v11 = vpack.c.bf16 %v2922_v15, %v2921_v9 }
 0x4a8   : > { %v1005_v10 = vpop.xlane.xlu1 %1004 }
 0x4a9   : > { %2990 = vrcp.f32 %v1005_v10  ;;  %v1002_v13 = vpop.xlane.xlu0 %1001 }
 0x4aa   : > { %2992 = vrcp.f32 %v1002_v13 }
 0x4b1   : > { %v1017_v14 = vpop.xlane.xlu1 %1016 }
 0x4b2   : > { %2994 = vrcp.f32 %v1017_v14  ;;  %v1014_v63 = vpop.xlane.xlu0 %1013 }
 0x4b3   : > { %v2991_v4 = vpop.eup %2990  ;;  %2996 = vrcp.f32 %v1014_v63 }
 0x4b4   : > { %v2993_v59 = vpop.eup %2992  ;;  %v1033_v1 = vmul.f32 %v2991_v4, %v3318_v37 }
 0x4b5   : > { %v1032_v17 = vmul.f32 %v2993_v59, %v2977_v41 }
 0x4b6   : > { %v1011_v6 = vpop.xlane.xlu1 %1010 }
 0x4b7   : > { %2664 = vmatprep.mubr.msk.f32.mxu0 %vm601_vm1, %v1032_v17  ;;  %2998 = vrcp.f32 %v1011_v6 }
 0x4b8   : > { %2665 = vmatmul.mubr.msk.f32.vlgmr.msra.gmra.mrb[6].mxu0 %vm601_vm1, %v1033_v1 }
 0x4b9   : > { %2807 = vmatpush3.bf16.msra.mxu0 %v3286_v45 }
 0x4ba   : > { %v1008_v18 = vpop.xlane.xlu0 %1007  ;;  %2814 = vmatprep.subr.msk.bf16.mxu0 %vm3262_vm2, %v2812_v11  ;;  %v1392_v30 = vpop.permute.xlu1 %1391 }
 0x4bb   : > { %3000 = vrcp.f32 %v1008_v18 }
 0x4bc   : > { %v2995_v19 = vpop.eup %2994 }
 0x4bd   : > { %v2997_v22 = vpop.eup %2996  ;;  %v1037_v25 = vmul.f32 %v2995_v19, %v3323_v47 }
 0x4be   : > { %v2930_v23 = vpop.permute.xlu0 %2929  ;;  %v1036_v24 = vmul.f32 %v2997_v22, %v3325_v51 }
 0x4bf   : > { %v2932_v26 = vunpack.i.h.bf16 %v2930_v23  ;;  %v2931_v27 = vunpack.i.l.bf16 %v2930_v23 }
 0x4c0   : > { %2678 = vmatprep.mubr.msk.f32.mxu0 %vm601_vm1, %v1036_v24 }
 0x4c1   : > { %v2824_v31 = vpack.c.bf16 %v2932_v26, %v2931_v27  ;;  %2679 = vmatmul.mubr.msk.f32.vlgmr.msra.gmra.mrb[8].mxu0 %vm601_vm1, %v1037_v25  ;;  %v2999_v45 = vpop.eup %2998 }
 0x4c2   : > { %2817 = vmatpush3.bf16.xpose.msk.msra.mxu0 %vm3262_vm2, %v2812_v11  ;;  %2692 = vmatprep.mubr.msk.f32.mxu0 %vm601_vm1, %v1392_v30  ;;  %v1035_v20 = vmul.f32 %v2999_v45, %v3331_v53 }
 0x4c3   : > { %2826 = vmatprep.subr.msk.bf16.mxu0 %vm3262_vm2, %v2824_v31 }
 0x4c5   : > { %v3001_v32 = vpop.eup %3000 }
 0x4c6   : > { %v1034_v35 = vmul.f32 %v3001_v32, %v3335_v54 }
 0x4c8   : > { %2671 = vmatprep.mubr.msk.f32.mxu1 %vm601_vm1, %v1034_v35 }
 0x4c9   : > { %2672 = vmatmul.mubr.msk.f32.vlgmr.msra.gmra.mrb[10].mxu1 %vm601_vm1, %v1035_v20 }
 0x4ca   : > { %2811 = vmatpush3.bf16.msra.mxu1 %v3295_v50 }
 0x4cb   : > { %2820 = vmatprep.subr.msk.bf16.mxu1 %vm3262_vm2, %v2818_v36 }
 0x4eb   : > { %v1023_v37 = vpop.xlane.xlu1 %1022 }
 0x4ec   : > { %3002 = vrcp.f32 %v1023_v37 }
 0x4ef   : > { %v1020_v40 = vpop.xlane.xlu0 %1019  ;;  %v2935_v41 = vpop.permute.xlu1 %2934 }
 0x4f0   : > { %3004 = vrcp.f32 %v1020_v40  ;;  %v2937_v21 = vunpack.i.h.bf16 %v2935_v41  ;;  %v2936_v50 = vunpack.i.l.bf16 %v2935_v41 }
 0x4f2   : > { %v2830_v53 = vpack.c.bf16 %v2937_v21, %v2936_v50 }
 0x4f3   : > { %v1394_v42 = vpop.permute.xlu0 %1393  ;;  %v1485_v43 = vpop.permute.xlu1 %1484 }
 0x4f4   : > { %2693 = vmatmul.mubr.msk.f32.vlgmr.msra.gmra.mrb[10].mxu0 %vm601_vm1, %v1394_v42 }
 0x4f5   : > { %2829 = vmatpush3.bf16.xpose.msk.msra.mxu0 %vm3262_vm2, %v2824_v31 }
 0x4f6   : > { %v3003_v46 = vpop.eup %3002 }
 0x4f7   : > { %v1483_v44 = vpop.permute.xlu0 %1482  ;;  %v1039_v52 = vmul.f32 %v3003_v46, %v3342_v49  ;;  %v1576_v29 = vpop.permute.xlu1 %1575 }
 0x4fa   : > { %v3005_v28 = vpop.eup %3004 }
 0x4fb   : > { %v1574_v47 = vpop.permute.xlu0 %1573  ;;  %v1038_v51 = vmul.f32 %v3005_v28, %v3346_v2  ;;  %v1667_v54 = vpop.permute.xlu1 %1666 }
 0x4fc   : > { %2706 = vmatprep.mubr.msk.f32.mxu0 %vm601_vm1, %v1574_v47 }
 0x4fd   : > { %2685 = vmatprep.mubr.msk.f32.mxu1 %vm601_vm1, %v1038_v51  ;;  %2707 = vmatmul.mubr.msk.f32.vlgmr.msra.gmra.mrb[12].mxu0 %vm601_vm1, %v1576_v29 }
 0x4fe   : > { %2686 = vmatmul.mubr.msk.f32.vlgmr.msra.gmra.mrb[12].mxu1 %vm601_vm1, %v1039_v52 }
 0x4ff   : > { %2823 = vmatpush3.bf16.xpose.msk.msra.mxu1 %vm3262_vm2, %v2818_v36  ;;  %2699 = vmatprep.mubr.msk.f32.mxu1 %vm601_vm1, %v1483_v44  ;;  %v1665_v38 = vpop.permute.xlu0 %1664 }
 0x500   : > { %2832 = vmatprep.subr.msk.bf16.mxu1 %vm3262_vm2, %v2830_v53 }
 0x506   : > { %2700 = vmatmul.mubr.msk.f32.vlgmr.msra.gmra.mrb[14].mxu1 %vm601_vm1, %v1485_v43 }
 0x507   : > { %2835 = vmatpush3.bf16.xpose.msk.msra.mxu1 %vm3262_vm2, %v2830_v53  ;;  %2713 = vmatprep.mubr.msk.f32.mxu1 %vm601_vm1, %v1665_v38 }
 0x50e   : > { %2714 = vmatmul.mubr.msk.f32.vlgmr.msra.gmra.mrb[16].mxu1 %vm601_vm1, %v1667_v54 }
 0x58b   : > { %v3400_v55 = vpop.f32.mrb[6].mxu0 }
 0x58c   : > { %v3402_v56 = vpop.f32.mrb[7].mxu0 }
 0x594   : > { %v3404_v57 = vpop.f32.mrb[8].mxu0 }
 0x595   : > { %v3406_v39 = vpop.f32.mrb[9].mxu0 }
 0x59c   : > { %v3408_v48 = vpop.f32.mrb[10].mxu1 }
 0x59d   : > { %v3410_v58 = vpop.f32.mrb[11].mxu1 }
 0x5c7   : > { %v2694_v49 = vpop.f32.mrb[10].mxu0 }
 0x5c8   : > { %v1479_v0 = vadd.f32 %v2694_v49, %v2488_v16  ;;  %v1473_v2 = vpop.f32.mrb[11].mxu0 }
 0x5c9   : > { %v1474_v61 = vadd.f32 %v2487_v60, %v1473_v2 }
 0x5ca   : > { %v1758_v5 = vsel %vm601_vm1, %v1479_v0, -inf }
 0x5cb   : > { %1759 = vmax.xlane.f32.xlu1 %v1758_v5  ;;  %v1755_v7 = vsel %vm601_vm1, %v1474_v61, -inf }
 0x5cc   : > { %1756 = vmax.xlane.f32.xlu0 %v1755_v7 }
 0x5d0   : > { %v2708_v10 = vpop.f32.mrb[12].mxu0 }
 0x5d1   : > { %v1661_v13 = vadd.f32 %v2708_v10, %v2488_v16  ;;  %v3420_v14 = vpop.f32.mrb[12].mxu1  ;;  %v1655_v63 = vpop.f32.mrb[13].mxu0 }
 0x5d2   : > { %v3422_v4 = vpop.f32.mrb[13].mxu1  ;;  %v1656_v11 = vadd.f32 %v2487_v60, %v1655_v63 }
 0x5d3   : > { %v1770_v59 = vsel %vm601_vm1, %v1661_v13, -inf }
 0x5d4   : > { %1771 = vmax.xlane.f32.xlu1 %v1770_v59  ;;  %v1767_v26 = vsel %vm601_vm1, %v1656_v11, -inf }
 0x5d9   : > { %v2701_v15 = vpop.f32.mrb[14].mxu1 }
 0x5da   : > { %v1570_v9 = vadd.f32 %v2701_v15, %v2488_v16  ;;  %v1564_v17 = vpop.f32.mrb[15].mxu1 }
 0x5db   : > { %v1565_v1 = vadd.f32 %v2487_v60, %v1564_v17 }
 0x5dc   : > { %v1764_v6 = vsel %vm601_vm1, %v1570_v9, -inf }
 0x5dd   : > { %1765 = vmax.xlane.f32.xlu0 %v1764_v6  ;;  %v1761_v18 = vsel %vm601_vm1, %v1565_v1, -inf }
 0x5e1   : > { %v2715_v19 = vpop.f32.mrb[16].mxu1  ;;  %1762 = vmax.xlane.f32.xlu0 %v1761_v18 }
 0x5e2   : > { %v1752_v22 = vadd.f32 %v2715_v19, %v2488_v16  ;;  %v1746_v23 = vpop.f32.mrb[17].mxu1 }
 0x5e3   : > { %v1747_v24 = vadd.f32 %v2487_v60, %v1746_v23 }
 0x5e4   : > { %v1776_v25 = vsel %vm601_vm1, %v1752_v22, -inf }
 0x5e5   : > { %1777 = vmax.xlane.f32.xlu1 %v1776_v25  ;;  %1768 = vmax.xlane.f32.xlu0 %v1767_v26  ;;  %v1773_v27 = vsel %vm601_vm1, %v1747_v24, -inf }
 0x5e9   : > { %1774 = vmax.xlane.f32.xlu0 %v1773_v27 }
 0x658   : > { %v1760_v30 = vpop.xlane.xlu1 %1759 }
 0x659   : > { %v1780_v31 = vsub.f32 %v1479_v0, %v1760_v30  ;;  %v1757_v45 = vpop.xlane.xlu0 %1756 }
 0x65a   : > { %v1779_v32 = vsub.f32 %v1474_v61, %v1757_v45 }
 0x65b   : > { %v1789_v33 = vmul.f32 1.442695, %v1780_v31 }
 0x65c   : > { %v1787_v34 = vmul.f32 1.442695, %v1779_v32 }
 0x65d   : > { %3006 = vpow2.f32 %v1789_v33 }
 0x65e   : > { %3008 = vpow2.f32 %v1787_v34 }
 0x661   : > { %v1772_v35 = vpop.xlane.xlu1 %1771 }
 0x662   : > { %v1784_v40 = vsub.f32 %v1661_v13, %v1772_v35 }
 0x664   : > { %v1797_v44 = vmul.f32 1.442695, %v1784_v40 }
 0x667   : > { %v3430_v20 = vpop.eup %3006 }
 0x668   : > { %v3009_v36 = vpop.eup %3008  ;;  %v1806_v37 = vsel %vm601_vm1, %v3430_v20, 0.0 }
 0x669   : > { %1807 = vadd.xlane.f32.xlu1 %v1806_v37  ;;  %v1803_v41 = vsel %vm601_vm1, %v3009_v36, 0.0 }
 0x66a   : > { %v1766_v42 = vpop.xlane.xlu0 %1765  ;;  %1804 = vadd.xlane.f32.xlu0 %v1803_v41 }
 0x66b   : > { %v1782_v43 = vsub.f32 %v1570_v9, %v1766_v42 }
 0x66d   : > { %v1793_v46 = vmul.f32 1.442695, %v1782_v43 }
 0x66e   : > { %v1763_v28 = vpop.xlane.xlu0 %1762 }
 0x66f   : > { %3010 = vpow2.f32 %v1793_v46  ;;  %v1781_v21 = vsub.f32 %v1565_v1, %v1763_v28 }
 0x670   : > { %3012 = vpow2.f32 %v1797_v44 }
 0x671   : > { %v1791_v50 = vmul.f32 1.442695, %v1781_v21 }
 0x672   : > { %v1778_v47 = vpop.xlane.xlu1 %1777  ;;  %v1769_v51 = vpop.xlane.xlu0 %1768 }
 0x673   : > { %3014 = vpow2.f32 %v1791_v50  ;;  %v1786_v52 = vsub.f32 %v1752_v22, %v1778_v47  ;;  %v1783_v29 = vsub.f32 %v1656_v11, %v1769_v51 }
 0x675   : > { %v1801_v53 = vmul.f32 1.442695, %v1786_v52  ;;  %v1795_v38 = vmul.f32 1.442695, %v1783_v29 }
 0x676   : > { %v1775_v54 = vpop.xlane.xlu0 %1774 }
 0x677   : > { %3016 = vpow2.f32 %v1801_v53  ;;  %v1785_v16 = vsub.f32 %v1747_v24, %v1775_v54  ;;  %v2232_v54 = vld [vmem:[%s3544_s5 + $0x8] sm:$0xff] }
 0x678   : > { %3018 = vpow2.f32 %v1795_v38 }
 0x679   : > { %v3011_v60 = vpop.eup %3010  ;;  %v1799_v49 = vmul.f32 1.442695, %v1785_v16  ;;  %v2233_v16 = vld [vmem:[%s3544_s5 + $0x10] sm:$0xff] }
 0x67a   : > { %v1812_v0 = vsel %vm601_vm1, %v3011_v60, 0.0  ;;  %v3436_v2 = vpop.eup %3012 }
 0x67b   : > { %3020 = vpow2.f32 %v1799_v49  ;;  %1813 = vadd.xlane.f32.xlu1 %v1812_v0  ;;  %v1818_v5 = vsel %vm601_vm1, %v3436_v2, 0.0  ;;  %v2234_v49 = vld [vmem:[%s3544_s5 + $0x18] sm:$0xff] }
 0x67c   : > { %v2856_v0 = vpack.c.bf16 %v2234_v49, %v2233_v16 }
 0x67d   : > { %v3015_v61 = vpop.eup %3014 }
 0x67e   : > { %v1809_v7 = vsel %vm601_vm1, %v3015_v61, 0.0 }
 0x67f   : > { %1819 = vadd.xlane.f32.xlu1 %v1818_v5  ;;  %1810 = vadd.xlane.f32.xlu0 %v1809_v7 }
 0x681   : > { %v3441_v10 = vpop.eup %3016 }
 0x682   : > { %v3443_v13 = vpop.eup %3018  ;;  %v1824_v63 = vsel %vm601_vm1, %v3441_v10, 0.0 }
 0x683   : > { %1825 = vadd.xlane.f32.xlu1 %v1824_v63  ;;  %v1815_v59 = vsel %vm601_vm1, %v3443_v13, 0.0 }
 0x684   : > { %1816 = vadd.xlane.f32.xlu0 %v1815_v59 }
 0x685   : > { %v3021_v15 = vpop.eup %3020 }
 0x686   : > { %v1821_v9 = vsel %vm601_vm1, %v3021_v15, 0.0 }
 0x688   : > { %1822 = vadd.xlane.f32.xlu0 %v1821_v9 }
 0x694   : > { %2944 = vrot.lane.b32.xlu1 %v3233_v3, %s3058_s20 }
 0x698   : > { %2949 = vrot.lane.b32.xlu1 %v3245_v8, %s3058_s20 }
 0x69c   : > { %2954 = vrot.lane.b32.xlu1 %v3254_v12, %s3058_s20 }
 0x69e   : > { %2939 = vrot.lane.b32.xlu0 %v3224_v62, %s3058_s20 }
 0x6f6   : > { %v1808_v11 = vpop.xlane.xlu1 %1807 }
 0x6f7   : > { %v1805_v17 = vpop.xlane.xlu0 %1804 }
 0x6f8   : > { %3022 = vrcp.f32 %v1805_v17 }
 0x702   : > { %v3023_v1 = vpop.eup %3022 }
 0x703   : > { %v1835_v6 = vmul.f32 %v3023_v1, %v3009_v36 }
 0x705   : > { %2720 = vmatprep.mubr.msk.f32.mxu0 %vm601_vm1, %v1835_v6 }
 0x708   : > { %v1814_v18 = vpop.xlane.xlu1 %1813 }
 0x709   : > { %3024 = vrcp.f32 %v1814_v18 }
 0x70c   : > { %v1820_v19 = vpop.xlane.xlu1 %1819  ;;  %v1811_v22 = vpop.xlane.xlu0 %1810 }
 0x70d   : > { %3026 = vrcp.f32 %v1811_v22 }
 0x70e   : > { %3028 = vrcp.f32 %v1808_v11 }
 0x710   : > { %v1826_v23 = vpop.xlane.xlu1 %1825 }
 0x711   : > { %v1817_v3 = vpop.xlane.xlu0 %1816 }
 0x712   : > { %3030 = vrcp.f32 %v1817_v3 }
 0x713   : > { %3032 = vrcp.f32 %v1826_v23  ;;  %v3025_v25 = vpop.eup %3024 }
 0x714   : > { %v2945_v8 = vpop.permute.xlu1 %2944  ;;  %v1838_v36 = vmul.f32 %v3025_v25, %v3011_v60  ;;  %v3039_v25 = vld [vmem:[%s3121_s11] sm:$0xff] }
 0x715   : > { %v2947_v12 = vunpack.i.h.bf16 %v2945_v8  ;;  %v2946_v62 = vunpack.i.l.bf16 %v2945_v8  ;;  %v1823_v24 = vpop.xlane.xlu0 %1822 }
 0x716   : > { %3034 = vrcp.f32 %v1823_v24 }
 0x717   : > { %3036 = vrcp.f32 %v1820_v19  ;;  %v2840_v26 = vpack.c.bf16 %v2947_v12, %v2946_v62  ;;  %v3027_v27 = vpop.eup %3026 }
 0x718   : > { %v2950_v30 = vpop.permute.xlu1 %2949  ;;  %v1837_v45 = vmul.f32 %v3027_v27, %v3015_v61  ;;  %v3029_v41 = vpop.eup %3028 }
 0x719   : > { %v2940_v31 = vpop.permute.xlu0 %2939  ;;  %2841 = vmatprep.subr.bf16.mxu1 %v2840_v26  ;;  %v2952_v32 = vunpack.i.h.bf16 %v2950_v30  ;;  %v2951_v33 = vunpack.i.l.bf16 %v2950_v30  ;;  %v1836_v47 = vmul.f32 %v3029_v41, %v3430_v20  ;;  %v2231_v20 = vld [vmem:[%s3544_s5] sm:$0xff] }
 0x71a   : > { %v2942_v34 = vunpack.i.h.bf16 %v2940_v31  ;;  %v2941_v35 = vunpack.i.l.bf16 %v2940_v31  ;;  %2843 = vmatpush3.bf16.msra.mxu1 %v2840_v26  ;;  %2727 = vmatprep.mubr.msk.f32.mxu1 %vm601_vm1, %v1837_v45  ;;  %v2852_v60 = vpack.c.bf16 %v2232_v54, %v2231_v20 }
 0x71b   : > { %v2844_v46 = vpack.c.bf16 %v2952_v32, %v2951_v33  ;;  %v3040_v32 = vld [vmem:[%s3121_s11 + $0x18] sm:$0xff] }
 0x71c   : > { %v2836_v37 = vpack.c.bf16 %v2942_v34, %v2941_v35  ;;  %v2955_v40 = vpop.permute.xlu1 %2954  ;;  %v3031_v44 = vpop.eup %3030  ;;  %v3041_v34 = vld [vmem:[%s3121_s11 + $0x10] sm:$0xff] }
 0x71d   : > { %v2957_v42 = vunpack.i.h.bf16 %v2955_v40  ;;  %v2956_v43 = vunpack.i.l.bf16 %v2955_v40  ;;  %2728 = vmatmul.mubr.msk.f32.vlgmr.msra.gmra.mrb[18].mxu1 %vm601_vm1, %v1838_v36  ;;  %v3033_v28 = vpop.eup %3032  ;;  %v1839_v52 = vmul.f32 %v3031_v44, %v3443_v13  ;;  %v3043_v44 = vld [vmem:[%s3121_s11 + $0x20] sm:$0xff] }
 0x71e   : > { %2837 = vmatprep.subr.bf16.mxu0 %v2836_v37  ;;  %v1842_v53 = vmul.f32 %v3033_v28, %v3441_v10 }
 0x71f   : > { %v2848_v21 = vpack.c.bf16 %v2957_v42, %v2956_v43  ;;  %2839 = vmatpush3.bf16.msra.mxu0 %v2836_v37  ;;  %v3042_v42 = vld [vmem:[%s3121_s11 + $0x28] sm:$0xff] }
 0x720   : > { %v3035_v50 = vpop.eup %3034  ;;  %2845 = vmatprep.subr.bf16.mxu0 %v2844_v46 }
 0x721   : > { %v3037_v51 = vpop.eup %3036  ;;  %2849 = vmatprep.subr.bf16.mxu1 %v2848_v21  ;;  %v1841_v29 = vmul.f32 %v3035_v50, %v3021_v15 }
 0x722   : > { %2721 = vmatmul.mubr.msk.f32.vlgmr.msra.gmra.mrb[14].mxu0 %vm601_vm1, %v1836_v47  ;;  %2851 = vmatpush3.bf16.msra.mxu1 %v2848_v21  ;;  %v1840_v38 = vmul.f32 %v3037_v51, %v3436_v2  ;;  %v3044_v51 = vld [vmem:[%s3121_s11 + $0x38] sm:$0xff] }
 0x723   : > { %2847 = vmatpush3.bf16.msra.mxu0 %v2844_v46  ;;  %2734 = vmatprep.mubr.msk.f32.mxu0 %vm601_vm1, %v1839_v52 }
 0x724   : > { %2741 = vmatprep.mubr.msk.f32.mxu1 %vm601_vm1, %v1841_v29  ;;  %2853 = vmatprep.subr.bf16.mxu0 %v2852_v60  ;;  %v3045_v29 = vld [vmem:[%s3121_s11 + $0x30] sm:$0xff] }
 0x725   : > { %2742 = vmatmul.mubr.msk.f32.vlgmr.msra.gmra.mrb[20].mxu1 %vm601_vm1, %v1842_v53 }
 0x726   : > { %2735 = vmatmul.mubr.msk.f32.vlgmr.msra.gmra.mrb[16].mxu0 %vm601_vm1, %v1840_v38 }
 0x727   : > { %2855 = vmatpush3.bf16.msra.mxu0 %v2852_v60 }
 0x728   : > { %2857 = vmatprep.subr.bf16.mxu0 %v2856_v0 }
 0x72b   : > { %2859 = vmatpush3.bf16.msra.mxu0 %v2856_v0 }
 0x7f0   : > { %v2729_v2 = vpop.f32.mrb[18].mxu1 }
 0x7f1   : > { %v2008_v61 = vpop.f32.mrb[19].mxu1 }
 0x7f5   : > { %v2722_v5 = vpop.f32.mrb[14].mxu0 }
 0x7f6   : > { %2201 = vrot.lane.b32.xlu1 %v2722_v5, %s3059_s10  ;;  %v1921_v7 = vpop.f32.mrb[15].mxu0 }
 0x7f7   : > { %2199 = vrot.lane.b32.xlu0 %v1921_v7, %s3059_s10 }
 0x7f8   : > { %v2743_v10 = vpop.f32.mrb[20].mxu1 }
 0x7f9   : > { %v2736_v13 = vpop.f32.mrb[16].mxu0  ;;  %v2182_v63 = vpop.f32.mrb[21].mxu1 }
 0x7fa   : > { %2205 = vrot.lane.b32.xlu1 %v2729_v2, %s3059_s10  ;;  %v2095_v59 = vpop.f32.mrb[17].mxu0 }
 0x7fb   : > { %2203 = vrot.lane.b32.xlu0 %v2008_v61, %s3059_s10 }
 0x7fe   : > { %2209 = vrot.lane.b32.xlu1 %v2736_v13, %s3059_s10 }
 0x7ff   : > { %2207 = vrot.lane.b32.xlu0 %v2095_v59, %s3059_s10 }
 0x802   : > { %2213 = vrot.lane.b32.xlu1 %v2743_v10, %s3059_s10 }
 0x803   : > { %2211 = vrot.lane.b32.xlu0 %v2182_v63, %s3059_s10 }
 0x868   : > { %v2202_v15 = vpop.permute.xlu1 %2201 }
 0x869   : > { %v2200_v9 = vpop.permute.xlu0 %2199  ;;  %v2224_v1 = vsel %vm601_vm1, %v3400_v55, %v2202_v15 }
 0x86a   : > { %v2223_v17 = vsel %vm601_vm1, %v3402_v56, %v2200_v9 }
 0x86b   : > { %2752 = vmatprep.mubr.msk.f32.mxu0 %vm319_vm0, %v2223_v17 }
 0x86c   : > { %v2206_v6 = vpop.permute.xlu1 %2205  ;;  %2753 = vmatmul.mubr.msk.f32.vlgmr.msra.gmra.mrb[18].mxu0 %vm319_vm0, %v2224_v1 }
 0x86d   : > { %v2204_v11 = vpop.permute.xlu0 %2203  ;;  %v2226_v19 = vsel %vm601_vm1, %v3408_v48, %v2206_v6 }
 0x86e   : > { %v2225_v18 = vsel %vm601_vm1, %v3410_v58, %v2204_v11 }
 0x86f   : > { %2755 = vmatprep.mubr.msk.f32.mxu0 %vm319_vm0, %v2225_v18 }
 0x870   : > { %2756 = vmatmul.mubr.msk.f32.gmra.mrb[20].mxu0 %vm319_vm0, %v2226_v19  ;;  %v2210_v56 = vpop.permute.xlu1 %2209 }
 0x871   : > { %v2208_v22 = vpop.permute.xlu0 %2207  ;;  %v2228_v23 = vsel %vm601_vm1, %v3404_v57, %v2210_v56  ;;  %v2513_v57 = vld [vmem:[%s3545_s6] ss:$0 sm:$0xff] }
 0x872   : > { %v2227_v55 = vsel %vm601_vm1, %v3406_v39, %v2208_v22 }
 0x873   : > { %2758 = vmatprep.mubr.msk.f32.mxu0 %vm319_vm0, %v2227_v55 }
 0x874   : > { %v2214_v58 = vpop.permute.xlu1 %2213  ;;  %2759 = vmatmul.mubr.msk.f32.gmra.mrb[22].mxu0 %vm319_vm0, %v2228_v23 }
 0x875   : > { %v2212_v48 = vpop.permute.xlu0 %2211  ;;  %v2230_v8 = vsel %vm601_vm1, %v3420_v14, %v2214_v58 }
 0x876   : > { %v2229_v3 = vsel %vm601_vm1, %v3422_v4, %v2212_v48  ;;  %v3038_v4 = vld [vmem:[%s3121_s11 + $0x8] sm:$0xff] }
 0x877   : > { %2761 = vmatprep.mubr.msk.f32.mxu0 %vm319_vm0, %v2229_v3 }
 0x878   : > { %2762 = vmatmul.mubr.msk.f32.gmra.mrb[24].mxu0 %vm319_vm0, %v2230_v8 }
 0x93f   : > { %v2754_v39 = vpop.f32.mrb[18].mxu0 }
 0x940   : > { %v2338_v12 = vadd.f32 %v2754_v39, %v2513_v57  ;;  %v2332_v62 = vpop.f32.mrb[19].mxu0 }
 0x941   : > { %v2333_v14 = vadd.f32 %v2513_v57, %v2332_v62 }
 0x942   : > { %v2372_v24 = vadd.f32 %v3038_v4, %v2338_v12 }
 0x943   : > { %v2371_v26 = vadd.f32 %v3039_v25, %v2333_v14  ;;  %v2757_v27 = vpop.f32.mrb[20].mxu0 }
 0x944   : > { %2380 = vst.msk [vmem:[%s3510_s16 + $0x8] sm:$0xff] %vm319_vm0, %v2372_v24  ;;  %v2348_v30 = vadd.f32 %v2757_v27, %v2513_v57  ;;  %v2342_v31 = vpop.f32.mrb[21].mxu0 }
 0x945   : > { %2379 = vst.msk [vmem:[%s3510_s16] sm:$0xff] %vm319_vm0, %v2371_v26  ;;  %v2343_v45 = vadd.f32 %v2513_v57, %v2342_v31 }
 0x946   : > { %v2374_v33 = vadd.f32 %v3040_v32, %v2348_v30 }
 0x947   : > { %v2373_v35 = vadd.f32 %v3041_v34, %v2343_v45  ;;  %v2760_v36 = vpop.f32.mrb[22].mxu0 }
 0x948   : > { %2382 = vst.msk [vmem:[%s3510_s16 + $0x18] sm:$0xff] %vm319_vm0, %v2374_v33  ;;  %v2358_v37 = vadd.f32 %v2760_v36, %v2513_v57  ;;  %v2352_v40 = vpop.f32.mrb[23].mxu0 }
 0x949   : > { %2381 = vst.msk [vmem:[%s3510_s16 + $0x10] sm:$0xff] %vm319_vm0, %v2373_v35  ;;  %v2353_v41 = vadd.f32 %v2513_v57, %v2352_v40 }
 0x94a   : > { %v2376_v43 = vadd.f32 %v3042_v42, %v2358_v37 }
 0x94b   : > { %v2375_v46 = vadd.f32 %v3043_v44, %v2353_v41  ;;  %v2763_v28 = vpop.f32.mrb[24].mxu0 }
 0x94c   : > { %2384 = vst.msk [vmem:[%s3510_s16 + $0x28] sm:$0xff] %vm319_vm0, %v2376_v43  ;;  %v2368_v21 = vadd.f32 %v2763_v28, %v2513_v57  ;;  %v2362_v50 = vpop.f32.mrb[25].mxu0 }
 0x94d   : > { %2383 = vst.msk [vmem:[%s3510_s16 + $0x20] sm:$0xff] %vm319_vm0, %v2375_v46  ;;  %v2363_v47 = vadd.f32 %v2513_v57, %v2362_v50 }
 0x94e   : > { %v2378_v52 = vadd.f32 %v3044_v51, %v2368_v21 }
 0x94f   : > { %v2377_v53 = vadd.f32 %v3045_v29, %v2363_v47 }
 0x950   : > { %2386 = vst.msk [vmem:[%s3510_s16 + $0x38] sm:$0xff] %vm319_vm0, %v2378_v52 }
 0x951   : > { %2385 = vst.msk [vmem:[%s3510_s16 + $0x30] sm:$0xff] %vm319_vm0, %v2377_v53 }
 0x952 PF: > { %s18_s27 = sadd.s32 1, %s3052_s27  }
 0x953   : > { %p15_p4 = scmp.ge.s32.totalorder %s18_s27, 4  }
 0x955   :  { %17 = sbr.rel (!%p15_p4) target bundleno = 1 (0x1), region = 83 }

</bundles_post_ra>
